<compile_context>
chip_gen: v7x
topology: tpu7x:2x2x1
jax: 0.10.0
libtpu: 0.0.40
codegen_flags: <defaults>
</compile_context>

<pallas_src>
import numpy as np
import jax
import jax.numpy as jnp
from jax.experimental import pallas as pl
from jax.experimental.pallas import tpu as pltpu

EPS = 1e-15


def _silu(x):
    return x * jax.nn.sigmoid(x)


def _round_up(x, m):
    return ((x + m - 1) // m) * m


# --------------------------------------------------------------------------- #
# Kernel: one message+update layer per grid step; H/V carried in output refs.
# --------------------------------------------------------------------------- #
def _decoder_layer_kernel(gji_ref, git_ref, h_in_ref, unitb_ref, rbf_ref,
                          mw1_ref, mb1_ref, mw2_ref, mb2_ref, mwr_ref,
                          uwuv_ref, uws1_ref, ubs1_ref, uws2_ref, ubs2_ref,
                          h_ref, v_ref):
    f32 = jnp.float32
    bf16 = jnp.bfloat16
    N, FP = h_ref.shape
    E = gji_ref.shape[0] // 2
    l = pl.program_id(0)

    @pl.when(l == 0)
    def _init():
        h_ref[...] = h_in_ref[...].astype(f32)
        v_ref[...] = jnp.zeros((N, 3 * FP), f32)

    h = h_ref[...]                      # (N, FP)   f32
    v = v_ref[...]                      # (N, 3FP)  f32, [vx | vy | vz]
    vx = v[:, 0 * FP:1 * FP]
    vy = v[:, 1 * FP:2 * FP]
    vz = v[:, 2 * FP:3 * FP]

    # ----------------------- EquiMessageCross -----------------------
    # inv_dense(H): Dense(F->F, swish) -> Dense(F->4F) on nodes, bf16 MXU / f32 acc.
    t1 = _silu(jnp.dot(h.astype(bf16), mw1_ref[...],
                       preferred_element_type=f32) + mb1_ref[...])        # (N, FP)
    phi_n = jnp.dot(t1.astype(bf16), mw2_ref[...],
                    preferred_element_type=f32) + mb2_ref[...]            # (N, 4FP)

    # Fused sender+receiver gather: [g_j; g_i] @ [phi_n | vx | vy | vz] -> (2E, 7FP)
    send = jnp.concatenate([phi_n, v], axis=-1).astype(bf16)              # (N, 7FP)
    g = jnp.dot(gji_ref[...], send, preferred_element_type=f32)           # (2E, 7FP)
    phi_e = g[0:E, 0 * FP:4 * FP]
    vjx = g[0:E, 4 * FP:5 * FP]
    vjy = g[0:E, 5 * FP:6 * FP]
    vjz = g[0:E, 6 * FP:7 * FP]
    vix = g[E:2 * E, 4 * FP:5 * FP]
    viy = g[E:2 * E, 5 * FP:6 * FP]
    viz = g[E:2 * E, 6 * FP:7 * FP]

    # dist filter: envelope and bias pre-folded into the augmented rbf matmul.
    w_s = jnp.dot(rbf_ref[...], mwr_ref[...], preferred_element_type=f32)  # (E, 4FP)

    inv_out = phi_e * w_s
    s0 = inv_out[:, 0 * FP:1 * FP]    # gate on v_j
    s1 = inv_out[:, 1 * FP:2 * FP]    # scalar message
    s2 = inv_out[:, 2 * FP:3 * FP]    # gate on unit r_ij
    s3 = inv_out[:, 3 * FP:4 * FP]    # gate on cross(v_i, v_j)

    cx = viy * vjz - viz * vjy
    cy = viz * vjx - vix * vjz
    cz = vix * vjy - viy * vjx

    ub = unitb_ref[...]                                                   # (E, 3FP)
    dv_ex = s2 * ub[:, 0 * FP:1 * FP] + s0 * vjx + s3 * cx
    dv_ey = s2 * ub[:, 1 * FP:2 * FP] + s0 * vjy + s3 * cy
    dv_ez = s2 * ub[:, 2 * FP:3 * FP] + s0 * vjz + s3 * cz

    # Fused scatter_add over receivers: one bf16 (N,E)x(E,4FP) matmul, f32 acc.
    edge_cat = jnp.concatenate([s1, dv_ex, dv_ey, dv_ez], axis=-1).astype(bf16)
    node_acc = jnp.dot(git_ref[...], edge_cat, preferred_element_type=f32)  # (N, 4FP)

    h = h + node_acc[:, 0 * FP:1 * FP]
    vx = vx + node_acc[:, 1 * FP:2 * FP]
    vy = vy + node_acc[:, 2 * FP:3 * FP]
    vz = vz + node_acc[:, 3 * FP:4 * FP]

    # ----------------------- UpdateBlock (PaiNN update) -----------------------
    # Fused U/V projections: [vx; vy; vz] @ [Wu | Wv] -> (3N, 2FP), bf16 MXU.
    v_rows = jnp.concatenate([vx, vy, vz], axis=0).astype(bf16)           # (3N, FP)
    up = jnp.dot(v_rows, uwuv_ref[...], preferred_element_type=f32)       # (3N, 2FP)
    ux = up[0 * N:1 * N, 0:FP]
    uy = up[1 * N:2 * N, 0:FP]
    uz = up[2 * N:3 * N, 0:FP]
    px = up[0 * N:1 * N, FP:2 * FP]
    py = up[1 * N:2 * N, FP:2 * FP]
    pz = up[2 * N:3 * N, FP:2 * FP]

    vvn = jnp.sqrt(px * px + py * py + pz * pz + EPS)                     # (N, FP)
    s_stack = jnp.concatenate([h, vvn], axis=-1)                          # (N, 2FP)
    t2 = _silu(jnp.dot(s_stack.astype(bf16), uws1_ref[...],
                       preferred_element_type=f32) + ubs1_ref[...])
    split = jnp.dot(t2.astype(bf16), uws2_ref[...],
                    preferred_element_type=f32) + ubs2_ref[...]           # (N, 3FP)
    a_vv = split[:, 0 * FP:1 * FP]
    a_sv = split[:, 1 * FP:2 * FP]
    a_ss = split[:, 2 * FP:3 * FP]

    vx = vx + ux * a_vv
    vy = vy + uy * a_vv
    vz = vz + uz * a_vv
    inner = ux * px + uy * py + uz * pz
    h = h + inner * a_sv + a_ss

    h_ref[...] = h
    v_ref[...] = jnp.concatenate([vx, vy, vz], axis=-1)


# --------------------------------------------------------------------------- #
# Host-side glue.
# --------------------------------------------------------------------------- #
def make_directed(nbr_list):
    """Mirror undirected neighbor lists (NumPy, host side)."""
    nbrs = np.asarray(nbr_list)
    gtr_ij = bool((nbrs[:, 0] > nbrs[:, 1]).any())
    gtr_ji = bool((nbrs[:, 1] > nbrs[:, 0]).any())
    directed = gtr_ij and gtr_ji
    if not directed:
        nbrs = np.concatenate([nbrs, nbrs[:, ::-1]], axis=0)
    return nbrs, directed


def init_params(key, num_conv, F, n_rbf):
    """Deterministic parameter init, stacked over layers (leading axis L)."""
    def dense(k, shape, fan_in):
        return jax.random.normal(k, shape, jnp.float32) / np.sqrt(fan_in)

    ks = jax.random.split(key, 12)
    L = num_conv
    return dict(
        mw1=dense(ks[0], (L, F, F), F),
        mb1=jnp.zeros((L, 1, F), jnp.float32),
        mw2=dense(ks[1], (L, F, 4 * F), F),
        mb2=jnp.zeros((L, 1, 4 * F), jnp.float32),
        mwr=dense(ks[2], (L, n_rbf, 4 * F), n_rbf),
        mbr=jnp.zeros((L, 1, 4 * F), jnp.float32),
        uwu=dense(ks[3], (L, F, F), F),
        uwv=dense(ks[4], (L, F, F), F),
        uws1=dense(ks[5], (L, 2 * F, F), 2 * F),
        ubs1=jnp.zeros((L, 1, F), jnp.float32),
        uws2=dense(ks[6], (L, F, 3 * F), F),
        ubs2=jnp.zeros((L, 1, 3 * F), jnp.float32),
    )


def _pad_feature_blocks(x, axis, nblk, F, FP):
    """Zero-pad an axis of logical size nblk*F to nblk*FP, block by block."""
    if FP == F:
        return x
    shape = x.shape
    assert shape[axis] == nblk * F, (shape, axis, nblk, F)
    x = x.reshape(shape[:axis] + (nblk, F) + shape[axis + 1:])
    pads = [(0, 0)] * x.ndim
    pads[axis + 1] = (0, FP - F)
    x = jnp.pad(x, pads)
    return x.reshape(shape[:axis] + (nblk * FP,) + shape[axis + 1:])


def _prepare_padded_params(p, F, FP, n_rbf):
    """Pad to lane-dense FP blocks; store matmul weights in bf16 (f32 biases)."""
    pf = _pad_feature_blocks
    bf16 = jnp.bfloat16
    mw1 = pf(pf(p["mw1"], 1, 1, F, FP), 2, 1, F, FP).astype(bf16)
    mb1 = pf(p["mb1"], 2, 1, F, FP)
    mw2 = pf(pf(p["mw2"], 1, 1, F, FP), 2, 4, F, FP).astype(bf16)
    mb2 = pf(p["mb2"], 2, 4, F, FP)
    # Fold bias into the rbf filter weight and pad the contraction dim to 128.
    mwr = pf(p["mwr"], 2, 4, F, FP)
    mbr = pf(p["mbr"], 2, 4, F, FP)
    mwr_aug = jnp.concatenate([mwr, mbr], axis=1)              # (L, n_rbf+1, 4FP)
    assert n_rbf + 1 <= 128
    mwr_aug = jnp.pad(mwr_aug,
                      ((0, 0), (0, 128 - (n_rbf + 1)), (0, 0))).astype(bf16)
    uwu = pf(pf(p["uwu"], 1, 1, F, FP), 2, 1, F, FP)
    uwv = pf(pf(p["uwv"], 1, 1, F, FP), 2, 1, F, FP)
    uwuv = jnp.concatenate([uwu, uwv], axis=-1).astype(bf16)   # (L, FP, 2FP)
    uws1 = pf(pf(p["uws1"], 1, 2, F, FP), 2, 1, F, FP).astype(bf16)
    ubs1 = pf(p["ubs1"], 2, 1, F, FP)
    uws2 = pf(pf(p["uws2"], 1, 1, F, FP), 2, 3, F, FP).astype(bf16)
    ubs2 = pf(p["ubs2"], 2, 3, F, FP)
    return dict(mw1=mw1, mb1=mb1, mw2=mw2, mb2=mb2, mwr=mwr_aug,
                uwuv=uwuv, uws1=uws1, ubs1=ubs1, uws2=uws2, ubs2=ubs2)


def equivariant_decoder(cg_xyz, CG_nbr_list, mapping, H, params,
                        *, num_conv, n_rbf, cutoff):
    del mapping  # unused by the reference forward
    nbrs, _ = make_directed(CG_nbr_list)
    N, F = H.shape
    FP = _round_up(F, 128)

    # Pad edge count to a multiple of 8 (sublane alignment); padded edges use
    # index -1 -> all-zero one-hot rows/columns -> contribute nothing.
    E_real = nbrs.shape[0]
    E = _round_up(E_real, 8)
    if E != E_real:
        nbrs = np.concatenate(
            [nbrs, np.full((E - E_real, 2), -1, dtype=nbrs.dtype)], axis=0)
    valid = jnp.asarray(
        (np.arange(E) < E_real).astype(np.float32))[:, None]            # (E, 1)

    nbr_i = jnp.asarray(nbrs[:, 0], jnp.int32)   # receivers
    nbr_j = jnp.asarray(nbrs[:, 1], jnp.int32)   # senders
    xyz = jnp.asarray(cg_xyz, jnp.float32)

    # deg_inv_sqrt is computed in the reference forward but never used; keep it
    # as cheap JAX glue for fidelity (guarded against degree-0 nodes).
    deg = jnp.zeros((N,), jnp.float32).at[nbr_i].add(valid[:, 0])
    _deg_inv_sqrt = jnp.where(deg > 0, jnp.sqrt(1.0 / jnp.maximum(deg, 1.0)), 0.0)  # noqa: F841

    # ---- edge geometry precomputed outside the kernel (cheap XLA gathers) ----
    r_ij = xyz[nbr_j] - xyz[nbr_i]                                       # (E, 3)
    dist = jnp.sqrt(jnp.sum(r_ij * r_ij, axis=-1, keepdims=True) + EPS)  # (E, 1)
    unit = (r_ij / dist) * valid                                         # (E, 3)
    n_idx = jnp.arange(1, n_rbf + 1, dtype=jnp.float32)[None, :]
    rbf = jnp.sin(n_idx * (np.pi / float(cutoff)) * dist) / dist         # (E, n_rbf)
    env = 0.5 * (jnp.cos(np.pi * dist / float(cutoff)) + 1.0)
    env = jnp.where(dist < float(cutoff), env, 0.0) * valid              # (E, 1)
    # Augmented, lane-dense rbf operand: [rbf*env | env | 0-pad to 128].
    rbf_aug = jnp.concatenate([rbf * env, env], axis=-1)                 # (E, n_rbf+1)
    rbf_aug = jnp.pad(rbf_aug,
                      ((0, 0), (0, 128 - (n_rbf + 1)))).astype(jnp.bfloat16)
    # Pre-broadcast unit vectors into a lane-dense (E, 3FP) buffer (fetched once).
    unit_b = jnp.concatenate(
        [jnp.broadcast_to(unit[:, k:k + 1], (E, FP)) for k in range(3)], axis=-1)

    # One-hot gather/scatter matrices (exact in bf16). Sender+receiver stacked.
    col = jnp.arange(N, dtype=jnp.int32)[None, :]
    g_i = (col == nbr_i[:, None]).astype(jnp.bfloat16)                   # (E, N)
    g_j = (col == nbr_j[:, None]).astype(jnp.bfloat16)                   # (E, N)
    gji = jnp.concatenate([g_j, g_i], axis=0)                            # (2E, N)
    g_it = jnp.transpose(g_i)                                            # (N, E)

    h_pad = _pad_feature_blocks(jnp.asarray(H, jnp.float32), 1, 1, F, FP)  # (N, FP)
    pp = _prepare_padded_params(params, F, FP, n_rbf)

    def inv_spec(shape):
        nd = len(shape)
        return pl.BlockSpec(shape, lambda l, _nd=nd: (0,) * _nd)

    def layer_spec(shape_wo_l):
        nd = len(shape_wo_l)
        return pl.BlockSpec((None,) + shape_wo_l,
                            lambda l, _nd=nd: (l,) + (0,) * _nd)

    in_specs = [
        inv_spec((2 * E, N)),          # [g_j; g_i]
        inv_spec((N, E)),              # g_i^T
        inv_spec((N, FP)),             # H (initial)
        inv_spec((E, 3 * FP)),         # pre-broadcast unit vectors
        inv_spec((E, 128)),            # augmented rbf (env & bias folded)
        layer_spec((FP, FP)),          # mw1 (bf16)
        layer_spec((1, FP)),           # mb1
        layer_spec((FP, 4 * FP)),      # mw2 (bf16)
        layer_spec((1, 4 * FP)),       # mb2
        layer_spec((128, 4 * FP)),     # mwr_aug (bf16)
        layer_spec((FP, 2 * FP)),      # [Wu | Wv] (bf16)
        layer_spec((2 * FP, FP)),      # uws1 (bf16)
        layer_spec((1, FP)),           # ubs1
        layer_spec((FP, 3 * FP)),      # uws2 (bf16)
        layer_spec((1, 3 * FP)),       # ubs2
    ]
    out_specs = (
        pl.BlockSpec((N, FP), lambda l: (0, 0)),        # H accumulator
        pl.BlockSpec((N, 3 * FP), lambda l: (0, 0)),    # V accumulator (lane-major)
    )
    out_shape = (jax.ShapeDtypeStruct((N, FP), jnp.float32),
                 jax.ShapeDtypeStruct((N, 3 * FP), jnp.float32))

    # Advisory cost estimate (per-layer MXU flops * num_conv; rough transcendentals).
    flops_per_layer = (
        2 * N * FP * FP + 2 * N * FP * 4 * FP            # inv_dense
        + 2 * (2 * E) * N * 7 * FP                       # fused gather
        + 2 * E * 128 * 4 * FP                           # rbf filter
        + 2 * N * E * 4 * FP                             # fused scatter
        + 2 * 3 * N * FP * 2 * FP                        # U/V projections
        + 2 * N * 2 * FP * FP + 2 * N * FP * 3 * FP      # update MLP
    )
    inputs_all = [gji, g_it, h_pad, unit_b, rbf_aug,
                  pp["mw1"], pp["mb1"], pp["mw2"], pp["mb2"], pp["mwr"],
                  pp["uwuv"], pp["uws1"], pp["ubs1"], pp["uws2"], pp["ubs2"]]
    bytes_accessed = int(sum(int(a.size) * a.dtype.itemsize for a in inputs_all)
                         + (N * FP + N * 3 * FP) * 4)
    cost = pl.CostEstimate(flops=int(flops_per_layer * num_conv),
                           transcendentals=int(3 * N * FP * num_conv),
                           bytes_accessed=bytes_accessed)

    h_out_p, v_out_p = pl.pallas_call(
        _decoder_layer_kernel,
        out_shape=out_shape,
        grid=(num_conv,),
        in_specs=in_specs,
        out_specs=out_specs,
        compiler_params=pltpu.CompilerParams(
            # Layer axis carries the H/V accumulators -> must stay sequential.
            dimension_semantics=("arbitrary",),
            vmem_limit_bytes=32 * 1024 * 1024),
        cost_estimate=cost,
    )(*inputs_all)

    H_out = h_out_p[:, :F]
    V_out = jnp.stack([v_out_p[:, 0 * FP:0 * FP + F],
                       v_out_p[:, 1 * FP:1 * FP + F],
                       v_out_p[:, 2 * FP:2 * FP + F]], axis=-1)   # (N, F, 3)
    return H_out, V_out


if __name__ == "__main__":
    # Small shapes consistent with the module: N CG beads, F = n_atom_basis.
    N = 16            # number of coarse-grained beads
    F = 32            # n_atom_basis
    n_rbf = 8
    cutoff = 5.0
    num_conv = 2

    key = jax.random.PRNGKey(0)
    k_xyz, k_h, k_p = jax.random.split(key, 3)

    cg_xyz = jax.random.uniform(k_xyz, (N, 3), jnp.float32, minval=0.0, maxval=4.0)
    H = jax.random.normal(k_h, (N, F), jnp.float32)

    # Undirected neighbor list (i < j); make_directed mirrors it to 2*E edges.
    und_edges = [(i, i + 1) for i in range(N - 1)]
    und_edges += [(0, 5), (3, 10), (7, 14), (2, 12), (4, 9),
                  (1, 8), (6, 13), (8, 15), (0, 15)]
    CG_nbr_list = np.asarray(und_edges, dtype=np.int32)       # (24, 2)
    mapping = jnp.zeros((N,), jnp.int32)                       # unused by forward

    params = init_params(k_p, num_conv, F, n_rbf)

    H_out, V_out = equivariant_decoder(cg_xyz, CG_nbr_list, mapping, H, params,
                                       num_conv=num_conv, n_rbf=n_rbf, cutoff=cutoff)
    jax.block_until_ready((H_out, V_out))

    assert H_out.shape == (N, F)
    assert V_out.shape == (N, F, 3)
    assert bool(jnp.all(jnp.isfinite(H_out))) and bool(jnp.all(jnp.isfinite(V_out)))
    print("KERNEL_OK")
</pallas_src>

<mosaic_0001>
module attributes {stable_mosaic.version = 11 : i64} {
  func.func @_decoder_layer_kernel(%arg0: i32, %arg1: memref<96x16xbf16, #tpu.memory_space<vmem>>, %arg2: memref<16x48xbf16, #tpu.memory_space<vmem>>, %arg3: memref<16x128xf32, #tpu.memory_space<vmem>>, %arg4: memref<48x384xf32, #tpu.memory_space<vmem>>, %arg5: memref<48x128xbf16, #tpu.memory_space<vmem>>, %arg6: memref<1x128x128xbf16, #tpu.memory_space<vmem>>, %arg7: memref<1x1x128xf32, #tpu.memory_space<vmem>>, %arg8: memref<1x128x512xbf16, #tpu.memory_space<vmem>>, %arg9: memref<1x1x512xf32, #tpu.memory_space<vmem>>, %arg10: memref<1x128x512xbf16, #tpu.memory_space<vmem>>, %arg11: memref<1x128x256xbf16, #tpu.memory_space<vmem>>, %arg12: memref<1x256x128xbf16, #tpu.memory_space<vmem>>, %arg13: memref<1x1x128xf32, #tpu.memory_space<vmem>>, %arg14: memref<1x128x384xbf16, #tpu.memory_space<vmem>>, %arg15: memref<1x1x384xf32, #tpu.memory_space<vmem>>, %arg16: memref<16x128xf32, #tpu.memory_space<vmem>>, %arg17: memref<16x384xf32, #tpu.memory_space<vmem>>) attributes {dimension_semantics = [#tpu.dimension_semantics<arbitrary>], iteration_bounds = array<i64: 2>, scalar_prefetch = 0 : i64, scratch_operands = 0 : i64, tpu.core_type = #tpu.core_type<tc>, window_params = [{pipeline_mode = #tpu.pipeline_mode<synchronous>, transform_indices = @transform_0, window_bounds = array<i64: 96, 16>}, {pipeline_mode = #tpu.pipeline_mode<synchronous>, transform_indices = @transform_1, window_bounds = array<i64: 16, 48>}, {pipeline_mode = #tpu.pipeline_mode<synchronous>, transform_indices = @transform_2, window_bounds = array<i64: 16, 128>}, {pipeline_mode = #tpu.pipeline_mode<synchronous>, transform_indices = @transform_3, window_bounds = array<i64: 48, 384>}, {pipeline_mode = #tpu.pipeline_mode<synchronous>, transform_indices = @transform_4, window_bounds = array<i64: 48, 128>}, {transform_indices = @transform_5, window_bounds = array<i64: 1, 128, 128>}, {transform_indices = @transform_6, window_bounds = array<i64: 1, 1, 128>}, {transform_indices = @transform_7, window_bounds = array<i64: 1, 128, 512>}, {transform_indices = @transform_8, window_bounds = array<i64: 1, 1, 512>}, {transform_indices = @transform_9, window_bounds = array<i64: 1, 128, 512>}, {transform_indices = @transform_10, window_bounds = array<i64: 1, 128, 256>}, {transform_indices = @transform_11, window_bounds = array<i64: 1, 256, 128>}, {transform_indices = @transform_12, window_bounds = array<i64: 1, 1, 128>}, {transform_indices = @transform_13, window_bounds = array<i64: 1, 128, 384>}, {transform_indices = @transform_14, window_bounds = array<i64: 1, 1, 384>}, {pipeline_mode = #tpu.pipeline_mode<synchronous>, transform_indices = @transform_15, window_bounds = array<i64: 16, 128>}, {pipeline_mode = #tpu.pipeline_mode<synchronous>, transform_indices = @transform_16, window_bounds = array<i64: 16, 384>}]} {
    %c0_i32 = arith.constant 0 : i32
    %0 = arith.cmpi eq, %arg0, %c0_i32 : i32
    %1 = arith.extui %0 : i1 to i32
    %c0_i32_0 = arith.constant 0 : i32
    %2 = arith.cmpi ne, %1, %c0_i32_0 : i32
    scf.if %2 {
      %c0_56 = arith.constant 0 : index
      %c0_57 = arith.constant 0 : index
      %152 = vector.load %arg3[%c0_56, %c0_57] : memref<16x128xf32, #tpu.memory_space<vmem>>, vector<16x128xf32>
      %c0_58 = arith.constant 0 : index
      %c0_59 = arith.constant 0 : index
      %153 = vector.load %arg16[%c0_58, %c0_59] : memref<16x128xf32, #tpu.memory_space<vmem>>, vector<16x128xf32>
      tpu.vector_store %arg16[%c0_58, %c0_59], %152 {strides = array<i32>} : memref<16x128xf32, #tpu.memory_space<vmem>>, vector<16x128xf32>,
      %cst_60 = arith.constant 0.000000e+00 : f32
      %154 = vector.broadcast %cst_60 : f32 to vector<16x384xf32>
      %c0_61 = arith.constant 0 : index
      %c0_62 = arith.constant 0 : index
      %155 = vector.load %arg17[%c0_61, %c0_62] : memref<16x384xf32, #tpu.memory_space<vmem>>, vector<16x384xf32>
      tpu.vector_store %arg17[%c0_61, %c0_62], %154 {strides = array<i32>} : memref<16x384xf32, #tpu.memory_space<vmem>>, vector<16x384xf32>,
    } else {
    }
    %c0 = arith.constant 0 : index
    %c0_1 = arith.constant 0 : index
    %3 = vector.load %arg16[%c0, %c0_1] : memref<16x128xf32, #tpu.memory_space<vmem>>, vector<16x128xf32>
    %c0_2 = arith.constant 0 : index
    %c0_3 = arith.constant 0 : index
    %4 = vector.load %arg17[%c0_2, %c0_3] : memref<16x384xf32, #tpu.memory_space<vmem>>, vector<16x384xf32>
    %5 = vector.extract_strided_slice %4 {offsets = [0, 0], sizes = [16, 128], strides = [1, 1]} : vector<16x384xf32> to vector<16x128xf32>
    %6 = vector.extract_strided_slice %4 {offsets = [0, 128], sizes = [16, 128], strides = [1, 1]} : vector<16x384xf32> to vector<16x128xf32>
    %7 = vector.extract_strided_slice %4 {offsets = [0, 256], sizes = [16, 128], strides = [1, 1]} : vector<16x384xf32> to vector<16x128xf32>
    %8 = arith.truncf %3 : vector<16x128xf32> to vector<16x128xbf16>
    %c0_4 = arith.constant 0 : index
    %c0_5 = arith.constant 0 : index
    %c0_6 = arith.constant 0 : index
    %9 = vector.load %arg6[%c0_4, %c0_5, %c0_6] : memref<1x128x128xbf16, #tpu.memory_space<vmem>>, vector<1x128x128xbf16>
    %10 = vector.shape_cast %9 : vector<1x128x128xbf16> to vector<128x128xbf16>
    %cst = arith.constant dense<0.000000e+00> : vector<16x128xf32>
    %11 = tpu.matmul %8, %10, %cst {dimension_numbers = #tpu.dot_dimension_numbers<[1], [0], [0], [1], [0, 0, 1, 1], [], []>} : vector<16x128xbf16>, vector<128x128xbf16>, vector<16x128xf32> -> vector<16x128xf32>
    %c0_7 = arith.constant 0 : index
    %c0_8 = arith.constant 0 : index
    %c0_9 = arith.constant 0 : index
    %12 = vector.load %arg7[%c0_7, %c0_8, %c0_9] : memref<1x1x128xf32, #tpu.memory_space<vmem>>, vector<1x1x128xf32>
    %13 = vector.shape_cast %12 : vector<1x1x128xf32> to vector<1x128xf32>
    %14 = vector.broadcast %13 : vector<1x128xf32> to vector<16x128xf32>
    %15 = arith.addf %11, %14 : vector<16x128xf32>
    %16 = arith.negf %15 : vector<16x128xf32>
    %17 = math.exp %16 : vector<16x128xf32>
    %cst_10 = arith.constant 1.000000e+00 : f32
    %18 = vector.broadcast %cst_10 : f32 to vector<16x128xf32>
    %19 = arith.addf %18, %17 : vector<16x128xf32>
    %20 = arith.divf %18, %19 : vector<16x128xf32>
    %21 = arith.mulf %15, %20 : vector<16x128xf32>
    %22 = arith.truncf %21 : vector<16x128xf32> to vector<16x128xbf16>
    %c0_11 = arith.constant 0 : index
    %c0_12 = arith.constant 0 : index
    %c0_13 = arith.constant 0 : index
    %23 = vector.load %arg8[%c0_11, %c0_12, %c0_13] : memref<1x128x512xbf16, #tpu.memory_space<vmem>>, vector<1x128x512xbf16>
    %24 = vector.shape_cast %23 : vector<1x128x512xbf16> to vector<128x512xbf16>
    %cst_14 = arith.constant dense<0.000000e+00> : vector<16x512xf32>
    %25 = tpu.matmul %22, %24, %cst_14 {dimension_numbers = #tpu.dot_dimension_numbers<[1], [0], [0], [1], [0, 0, 1, 1], [], []>} : vector<16x128xbf16>, vector<128x512xbf16>, vector<16x512xf32> -> vector<16x512xf32>
    %c0_15 = arith.constant 0 : index
    %c0_16 = arith.constant 0 : index
    %c0_17 = arith.constant 0 : index
    %26 = vector.load %arg9[%c0_15, %c0_16, %c0_17] : memref<1x1x512xf32, #tpu.memory_space<vmem>>, vector<1x1x512xf32>
    %27 = vector.shape_cast %26 : vector<1x1x512xf32> to vector<1x512xf32>
    %28 = vector.broadcast %27 : vector<1x512xf32> to vector<16x512xf32>
    %29 = arith.addf %25, %28 : vector<16x512xf32>
    %30 = tpu.concatenate %29, %4 in 1 : vector<16x512xf32>, vector<16x384xf32> -> vector<16x896xf32>
    %31 = arith.truncf %30 : vector<16x896xf32> to vector<16x896xbf16>
    %c0_18 = arith.constant 0 : index
    %c0_19 = arith.constant 0 : index
    %32 = vector.load %arg1[%c0_18, %c0_19] : memref<96x16xbf16, #tpu.memory_space<vmem>>, vector<96x16xbf16>
    %cst_20 = arith.constant dense<0.000000e+00> : vector<96x896xf32>
    %33 = tpu.matmul %32, %31, %cst_20 {dimension_numbers = #tpu.dot_dimension_numbers<[1], [0], [0], [1], [0, 0, 1, 1], [], []>} : vector<96x16xbf16>, vector<16x896xbf16>, vector<96x896xf32> -> vector<96x896xf32>
    %34 = vector.extract_strided_slice %33 {offsets = [0, 0], sizes = [48, 512], strides = [1, 1]} : vector<96x896xf32> to vector<48x512xf32>
    %35 = vector.extract_strided_slice %33 {offsets = [0, 512], sizes = [48, 128], strides = [1, 1]} : vector<96x896xf32> to vector<48x128xf32>
    %36 = vector.extract_strided_slice %33 {offsets = [0, 640], sizes = [48, 128], strides = [1, 1]} : vector<96x896xf32> to vector<48x128xf32>
    %37 = vector.extract_strided_slice %33 {offsets = [0, 768], sizes = [48, 128], strides = [1, 1]} : vector<96x896xf32> to vector<48x128xf32>
    %38 = vector.extract_strided_slice %33 {offsets = [48, 512], sizes = [48, 128], strides = [1, 1]} : vector<96x896xf32> to vector<48x128xf32>
    %39 = vector.extract_strided_slice %33 {offsets = [48, 640], sizes = [48, 128], strides = [1, 1]} : vector<96x896xf32> to vector<48x128xf32>
    %40 = vector.extract_strided_slice %33 {offsets = [48, 768], sizes = [48, 128], strides = [1, 1]} : vector<96x896xf32> to vector<48x128xf32>
    %c0_21 = arith.constant 0 : index
    %c0_22 = arith.constant 0 : index
    %41 = vector.load %arg5[%c0_21, %c0_22] : memref<48x128xbf16, #tpu.memory_space<vmem>>, vector<48x128xbf16>
    %c0_23 = arith.constant 0 : index
    %c0_24 = arith.constant 0 : index
    %c0_25 = arith.constant 0 : index
    %42 = vector.load %arg10[%c0_23, %c0_24, %c0_25] : memref<1x128x512xbf16, #tpu.memory_space<vmem>>, vector<1x128x512xbf16>
    %43 = vector.shape_cast %42 : vector<1x128x512xbf16> to vector<128x512xbf16>
    %cst_26 = arith.constant dense<0.000000e+00> : vector<48x512xf32>
    %44 = tpu.matmul %41, %43, %cst_26 {dimension_numbers = #tpu.dot_dimension_numbers<[1], [0], [0], [1], [0, 0, 1, 1], [], []>} : vector<48x128xbf16>, vector<128x512xbf16>, vector<48x512xf32> -> vector<48x512xf32>
    %45 = arith.mulf %34, %44 : vector<48x512xf32>
    %46 = vector.extract_strided_slice %45 {offsets = [0, 0], sizes = [48, 128], strides = [1, 1]} : vector<48x512xf32> to vector<48x128xf32>
    %47 = vector.extract_strided_slice %45 {offsets = [0, 128], sizes = [48, 128], strides = [1, 1]} : vector<48x512xf32> to vector<48x128xf32>
    %48 = vector.extract_strided_slice %45 {offsets = [0, 256], sizes = [48, 128], strides = [1, 1]} : vector<48x512xf32> to vector<48x128xf32>
    %49 = vector.extract_strided_slice %45 {offsets = [0, 384], sizes = [48, 128], strides = [1, 1]} : vector<48x512xf32> to vector<48x128xf32>
    %50 = arith.mulf %39, %37 : vector<48x128xf32>
    %51 = arith.mulf %40, %36 : vector<48x128xf32>
    %52 = arith.subf %50, %51 : vector<48x128xf32>
    %53 = arith.mulf %40, %35 : vector<48x128xf32>
    %54 = arith.mulf %38, %37 : vector<48x128xf32>
    %55 = arith.subf %53, %54 : vector<48x128xf32>
    %56 = arith.mulf %38, %36 : vector<48x128xf32>
    %57 = arith.mulf %39, %35 : vector<48x128xf32>
    %58 = arith.subf %56, %57 : vector<48x128xf32>
    %c0_27 = arith.constant 0 : index
    %c0_28 = arith.constant 0 : index
    %59 = vector.load %arg4[%c0_27, %c0_28] : memref<48x384xf32, #tpu.memory_space<vmem>>, vector<48x384xf32>
    %60 = vector.extract_strided_slice %59 {offsets = [0, 0], sizes = [48, 128], strides = [1, 1]} : vector<48x384xf32> to vector<48x128xf32>
    %61 = arith.mulf %48, %60 : vector<48x128xf32>
    %62 = arith.mulf %46, %35 : vector<48x128xf32>
    %63 = arith.addf %61, %62 : vector<48x128xf32>
    %64 = arith.mulf %49, %52 : vector<48x128xf32>
    %65 = arith.addf %63, %64 : vector<48x128xf32>
    %66 = vector.extract_strided_slice %59 {offsets = [0, 128], sizes = [48, 128], strides = [1, 1]} : vector<48x384xf32> to vector<48x128xf32>
    %67 = arith.mulf %48, %66 : vector<48x128xf32>
    %68 = arith.mulf %46, %36 : vector<48x128xf32>
    %69 = arith.addf %67, %68 : vector<48x128xf32>
    %70 = arith.mulf %49, %55 : vector<48x128xf32>
    %71 = arith.addf %69, %70 : vector<48x128xf32>
    %72 = vector.extract_strided_slice %59 {offsets = [0, 256], sizes = [48, 128], strides = [1, 1]} : vector<48x384xf32> to vector<48x128xf32>
    %73 = arith.mulf %48, %72 : vector<48x128xf32>
    %74 = arith.mulf %46, %37 : vector<48x128xf32>
    %75 = arith.addf %73, %74 : vector<48x128xf32>
    %76 = arith.mulf %49, %58 : vector<48x128xf32>
    %77 = arith.addf %75, %76 : vector<48x128xf32>
    %78 = tpu.concatenate %47, %65, %71, %77 in 1 : vector<48x128xf32>, vector<48x128xf32>, vector<48x128xf32>, vector<48x128xf32> -> vector<48x512xf32>
    %79 = arith.truncf %78 : vector<48x512xf32> to vector<48x512xbf16>
    %c0_29 = arith.constant 0 : index
    %c0_30 = arith.constant 0 : index
    %80 = vector.load %arg2[%c0_29, %c0_30] : memref<16x48xbf16, #tpu.memory_space<vmem>>, vector<16x48xbf16>
    %cst_31 = arith.constant dense<0.000000e+00> : vector<16x512xf32>
    %81 = tpu.matmul %80, %79, %cst_31 {dimension_numbers = #tpu.dot_dimension_numbers<[1], [0], [0], [1], [0, 0, 1, 1], [], []>} : vector<16x48xbf16>, vector<48x512xbf16>, vector<16x512xf32> -> vector<16x512xf32>
    %82 = vector.extract_strided_slice %81 {offsets = [0, 0], sizes = [16, 128], strides = [1, 1]} : vector<16x512xf32> to vector<16x128xf32>
    %83 = arith.addf %3, %82 : vector<16x128xf32>
    %84 = vector.extract_strided_slice %81 {offsets = [0, 128], sizes = [16, 128], strides = [1, 1]} : vector<16x512xf32> to vector<16x128xf32>
    %85 = arith.addf %5, %84 : vector<16x128xf32>
    %86 = vector.extract_strided_slice %81 {offsets = [0, 256], sizes = [16, 128], strides = [1, 1]} : vector<16x512xf32> to vector<16x128xf32>
    %87 = arith.addf %6, %86 : vector<16x128xf32>
    %88 = vector.extract_strided_slice %81 {offsets = [0, 384], sizes = [16, 128], strides = [1, 1]} : vector<16x512xf32> to vector<16x128xf32>
    %89 = arith.addf %7, %88 : vector<16x128xf32>
    %90 = tpu.concatenate %85, %87, %89 in 0 : vector<16x128xf32>, vector<16x128xf32>, vector<16x128xf32> -> vector<48x128xf32>
    %91 = arith.truncf %90 : vector<48x128xf32> to vector<48x128xbf16>
    %c0_32 = arith.constant 0 : index
    %c0_33 = arith.constant 0 : index
    %c0_34 = arith.constant 0 : index
    %92 = vector.load %arg11[%c0_32, %c0_33, %c0_34] : memref<1x128x256xbf16, #tpu.memory_space<vmem>>, vector<1x128x256xbf16>
    %93 = vector.shape_cast %92 : vector<1x128x256xbf16> to vector<128x256xbf16>
    %cst_35 = arith.constant dense<0.000000e+00> : vector<48x256xf32>
    %94 = tpu.matmul %91, %93, %cst_35 {dimension_numbers = #tpu.dot_dimension_numbers<[1], [0], [0], [1], [0, 0, 1, 1], [], []>} : vector<48x128xbf16>, vector<128x256xbf16>, vector<48x256xf32> -> vector<48x256xf32>
    %95 = vector.extract_strided_slice %94 {offsets = [0, 0], sizes = [16, 128], strides = [1, 1]} : vector<48x256xf32> to vector<16x128xf32>
    %96 = vector.extract_strided_slice %94 {offsets = [16, 0], sizes = [16, 128], strides = [1, 1]} : vector<48x256xf32> to vector<16x128xf32>
    %97 = vector.extract_strided_slice %94 {offsets = [32, 0], sizes = [16, 128], strides = [1, 1]} : vector<48x256xf32> to vector<16x128xf32>
    %98 = vector.extract_strided_slice %94 {offsets = [0, 128], sizes = [16, 128], strides = [1, 1]} : vector<48x256xf32> to vector<16x128xf32>
    %99 = vector.extract_strided_slice %94 {offsets = [16, 128], sizes = [16, 128], strides = [1, 1]} : vector<48x256xf32> to vector<16x128xf32>
    %100 = vector.extract_strided_slice %94 {offsets = [32, 128], sizes = [16, 128], strides = [1, 1]} : vector<48x256xf32> to vector<16x128xf32>
    %101 = arith.mulf %98, %98 : vector<16x128xf32>
    %102 = arith.mulf %99, %99 : vector<16x128xf32>
    %103 = arith.addf %101, %102 : vector<16x128xf32>
    %104 = arith.mulf %100, %100 : vector<16x128xf32>
    %105 = arith.addf %103, %104 : vector<16x128xf32>
    %cst_36 = arith.constant 1.000000e-15 : f32
    %106 = vector.broadcast %cst_36 : f32 to vector<16x128xf32>
    %107 = arith.addf %105, %106 : vector<16x128xf32>
    %108 = math.sqrt %107 : vector<16x128xf32>
    %109 = tpu.concatenate %83, %108 in 1 : vector<16x128xf32>, vector<16x128xf32> -> vector<16x256xf32>
    %110 = arith.truncf %109 : vector<16x256xf32> to vector<16x256xbf16>
    %c0_37 = arith.constant 0 : index
    %c0_38 = arith.constant 0 : index
    %c0_39 = arith.constant 0 : index
    %111 = vector.load %arg12[%c0_37, %c0_38, %c0_39] : memref<1x256x128xbf16, #tpu.memory_space<vmem>>, vector<1x256x128xbf16>
    %112 = vector.shape_cast %111 : vector<1x256x128xbf16> to vector<256x128xbf16>
    %cst_40 = arith.constant dense<0.000000e+00> : vector<16x128xf32>
    %113 = tpu.matmul %110, %112, %cst_40 {dimension_numbers = #tpu.dot_dimension_numbers<[1], [0], [0], [1], [0, 0, 1, 1], [], []>} : vector<16x256xbf16>, vector<256x128xbf16>, vector<16x128xf32> -> vector<16x128xf32>
    %c0_41 = arith.constant 0 : index
    %c0_42 = arith.constant 0 : index
    %c0_43 = arith.constant 0 : index
    %114 = vector.load %arg13[%c0_41, %c0_42, %c0_43] : memref<1x1x128xf32, #tpu.memory_space<vmem>>, vector<1x1x128xf32>
    %115 = vector.shape_cast %114 : vector<1x1x128xf32> to vector<1x128xf32>
    %116 = vector.broadcast %115 : vector<1x128xf32> to vector<16x128xf32>
    %117 = arith.addf %113, %116 : vector<16x128xf32>
    %118 = arith.negf %117 : vector<16x128xf32>
    %119 = math.exp %118 : vector<16x128xf32>
    %cst_44 = arith.constant 1.000000e+00 : f32
    %120 = vector.broadcast %cst_44 : f32 to vector<16x128xf32>
    %121 = arith.addf %120, %119 : vector<16x128xf32>
    %122 = arith.divf %120, %121 : vector<16x128xf32>
    %123 = arith.mulf %117, %122 : vector<16x128xf32>
    %124 = arith.truncf %123 : vector<16x128xf32> to vector<16x128xbf16>
    %c0_45 = arith.constant 0 : index
    %c0_46 = arith.constant 0 : index
    %c0_47 = arith.constant 0 : index
    %125 = vector.load %arg14[%c0_45, %c0_46, %c0_47] : memref<1x128x384xbf16, #tpu.memory_space<vmem>>, vector<1x128x384xbf16>
    %126 = vector.shape_cast %125 : vector<1x128x384xbf16> to vector<128x384xbf16>
    %cst_48 = arith.constant dense<0.000000e+00> : vector<16x384xf32>
    %127 = tpu.matmul %124, %126, %cst_48 {dimension_numbers = #tpu.dot_dimension_numbers<[1], [0], [0], [1], [0, 0, 1, 1], [], []>} : vector<16x128xbf16>, vector<128x384xbf16>, vector<16x384xf32> -> vector<16x384xf32>
    %c0_49 = arith.constant 0 : index
    %c0_50 = arith.constant 0 : index
    %c0_51 = arith.constant 0 : index
    %128 = vector.load %arg15[%c0_49, %c0_50, %c0_51] : memref<1x1x384xf32, #tpu.memory_space<vmem>>, vector<1x1x384xf32>
    %129 = vector.shape_cast %128 : vector<1x1x384xf32> to vector<1x384xf32>
    %130 = vector.broadcast %129 : vector<1x384xf32> to vector<16x384xf32>
    %131 = arith.addf %127, %130 : vector<16x384xf32>
    %132 = vector.extract_strided_slice %131 {offsets = [0, 0], sizes = [16, 128], strides = [1, 1]} : vector<16x384xf32> to vector<16x128xf32>
    %133 = vector.extract_strided_slice %131 {offsets = [0, 128], sizes = [16, 128], strides = [1, 1]} : vector<16x384xf32> to vector<16x128xf32>
    %134 = vector.extract_strided_slice %131 {offsets = [0, 256], sizes = [16, 128], strides = [1, 1]} : vector<16x384xf32> to vector<16x128xf32>
    %135 = arith.mulf %95, %132 : vector<16x128xf32>
    %136 = arith.addf %85, %135 : vector<16x128xf32>
    %137 = arith.mulf %96, %132 : vector<16x128xf32>
    %138 = arith.addf %87, %137 : vector<16x128xf32>
    %139 = arith.mulf %97, %132 : vector<16x128xf32>
    %140 = arith.addf %89, %139 : vector<16x128xf32>
    %141 = arith.mulf %95, %98 : vector<16x128xf32>
    %142 = arith.mulf %96, %99 : vector<16x128xf32>
    %143 = arith.addf %141, %142 : vector<16x128xf32>
    %144 = arith.mulf %97, %100 : vector<16x128xf32>
    %145 = arith.addf %143, %144 : vector<16x128xf32>
    %146 = arith.mulf %145, %133 : vector<16x128xf32>
    %147 = arith.addf %83, %146 : vector<16x128xf32>
    %148 = arith.addf %147, %134 : vector<16x128xf32>
    %c0_52 = arith.constant 0 : index
    %c0_53 = arith.constant 0 : index
    %149 = vector.load %arg16[%c0_52, %c0_53] : memref<16x128xf32, #tpu.memory_space<vmem>>, vector<16x128xf32>
    tpu.vector_store %arg16[%c0_52, %c0_53], %148 {strides = array<i32>} : memref<16x128xf32, #tpu.memory_space<vmem>>, vector<16x128xf32>,
    %150 = tpu.concatenate %136, %138, %140 in 1 : vector<16x128xf32>, vector<16x128xf32>, vector<16x128xf32> -> vector<16x384xf32>
    %c0_54 = arith.constant 0 : index
    %c0_55 = arith.constant 0 : index
    %151 = vector.load %arg17[%c0_54, %c0_55] : memref<16x384xf32, #tpu.memory_space<vmem>>, vector<16x384xf32>
    tpu.vector_store %arg17[%c0_54, %c0_55], %150 {strides = array<i32>} : memref<16x384xf32, #tpu.memory_space<vmem>>, vector<16x384xf32>,
    return
  }
  func.func @transform_0(%arg0: i32) -> (i32, i32) {
    %c0_i32 = arith.constant 0 : i32
    %c0_i32_0 = arith.constant 0 : i32
    %c0_i32_1 = arith.constant 0 : i32
    return %c0_i32, %c0_i32_0 : i32, i32
  }
  func.func @transform_1(%arg0: i32) -> (i32, i32) {
    %c0_i32 = arith.constant 0 : i32
    %c0_i32_0 = arith.constant 0 : i32
    %c0_i32_1 = arith.constant 0 : i32
    return %c0_i32, %c0_i32_0 : i32, i32
  }
  func.func @transform_2(%arg0: i32) -> (i32, i32) {
    %c0_i32 = arith.constant 0 : i32
    %c0_i32_0 = arith.constant 0 : i32
    %c0_i32_1 = arith.constant 0 : i32
    return %c0_i32, %c0_i32_0 : i32, i32
  }
  func.func @transform_3(%arg0: i32) -> (i32, i32) {
    %c0_i32 = arith.constant 0 : i32
    %c0_i32_0 = arith.constant 0 : i32
    %c0_i32_1 = arith.constant 0 : i32
    return %c0_i32, %c0_i32_0 : i32, i32
  }
  func.func @transform_4(%arg0: i32) -> (i32, i32) {
    %c0_i32 = arith.constant 0 : i32
    %c0_i32_0 = arith.constant 0 : i32
    %c0_i32_1 = arith.constant 0 : i32
    return %c0_i32, %c0_i32_0 : i32, i32
  }
  func.func @transform_5(%arg0: i32) -> (i32, i32, i32) {
    %c0_i32 = arith.constant 0 : i32
    %c0_i32_0 = arith.constant 0 : i32
    %c0_i32_1 = arith.constant 0 : i32
    return %arg0, %c0_i32, %c0_i32_0 : i32, i32, i32
  }
  func.func @transform_6(%arg0: i32) -> (i32, i32, i32) {
    %c0_i32 = arith.constant 0 : i32
    %c0_i32_0 = arith.constant 0 : i32
    %c0_i32_1 = arith.constant 0 : i32
    return %arg0, %c0_i32, %c0_i32_0 : i32, i32, i32
  }
  func.func @transform_7(%arg0: i32) -> (i32, i32, i32) {
    %c0_i32 = arith.constant 0 : i32
    %c0_i32_0 = arith.constant 0 : i32
    %c0_i32_1 = arith.constant 0 : i32
    return %arg0, %c0_i32, %c0_i32_0 : i32, i32, i32
  }
  func.func @transform_8(%arg0: i32) -> (i32, i32, i32) {
    %c0_i32 = arith.constant 0 : i32
    %c0_i32_0 = arith.constant 0 : i32
    %c0_i32_1 = arith.constant 0 : i32
    return %arg0, %c0_i32, %c0_i32_0 : i32, i32, i32
  }
  func.func @transform_9(%arg0: i32) -> (i32, i32, i32) {
    %c0_i32 = arith.constant 0 : i32
    %c0_i32_0 = arith.constant 0 : i32
    %c0_i32_1 = arith.constant 0 : i32
    return %arg0, %c0_i32, %c0_i32_0 : i32, i32, i32
  }
  func.func @transform_10(%arg0: i32) -> (i32, i32, i32) {
    %c0_i32 = arith.constant 0 : i32
    %c0_i32_0 = arith.constant 0 : i32
    %c0_i32_1 = arith.constant 0 : i32
    return %arg0, %c0_i32, %c0_i32_0 : i32, i32, i32
  }
  func.func @transform_11(%arg0: i32) -> (i32, i32, i32) {
    %c0_i32 = arith.constant 0 : i32
    %c0_i32_0 = arith.constant 0 : i32
    %c0_i32_1 = arith.constant 0 : i32
    return %arg0, %c0_i32, %c0_i32_0 : i32, i32, i32
  }
  func.func @transform_12(%arg0: i32) -> (i32, i32, i32) {
    %c0_i32 = arith.constant 0 : i32
    %c0_i32_0 = arith.constant 0 : i32
    %c0_i32_1 = arith.constant 0 : i32
    return %arg0, %c0_i32, %c0_i32_0 : i32, i32, i32
  }
  func.func @transform_13(%arg0: i32) -> (i32, i32, i32) {
    %c0_i32 = arith.constant 0 : i32
    %c0_i32_0 = arith.constant 0 : i32
    %c0_i32_1 = arith.constant 0 : i32
    return %arg0, %c0_i32, %c0_i32_0 : i32, i32, i32
  }
  func.func @transform_14(%arg0: i32) -> (i32, i32, i32) {
    %c0_i32 = arith.constant 0 : i32
    %c0_i32_0 = arith.constant 0 : i32
    %c0_i32_1 = arith.constant 0 : i32
    return %arg0, %c0_i32, %c0_i32_0 : i32, i32, i32
  }
  func.func @transform_15(%arg0: i32) -> (i32, i32) {
    %c0_i32 = arith.constant 0 : i32
    %c0_i32_0 = arith.constant 0 : i32
    %c0_i32_1 = arith.constant 0 : i32
    return %c0_i32, %c0_i32_0 : i32, i32
  }
  func.func @transform_16(%arg0: i32) -> (i32, i32) {
    %c0_i32 = arith.constant 0 : i32
    %c0_i32_0 = arith.constant 0 : i32
    %c0_i32_1 = arith.constant 0 : i32
    return %c0_i32, %c0_i32_0 : i32, i32
  }
}

</mosaic_0001>

<bundles_post_ra>
// kernel: tpu_custom_call.1
= control target key start
LH: loop header
LB: loop body
LE: loop exit
PB: predicated region body
PF: predicated region fallthrough
CT: control target
= control target key end

     0   :  { %s5470_s0 = inlined_call_operand.vmem [shape: bf16[96,16], index: 0, kind: input, shape index: {}]   ;;  %s5471_s1 = inlined_call_operand.vmem [shape: bf16[16,48], index: 1, kind: input, shape index: {}]   ;;  %s5472_s2 = inlined_call_operand.vmem [shape: f32[16,128], index: 2, kind: input, shape index: {}]   ;;  %s5473_s3 = inlined_call_operand.hbm [shape: f32[48,384], index: 3, kind: input, shape index: {}]   ;;  %s5474_s4 = inlined_call_operand.vmem [shape: bf16[48,128], index: 4, kind: input, shape index: {}]   ;;  %s5475_s5 = inlined_call_operand.hbm [shape: bf16[2,128,128], index: 5, kind: input, shape index: {}]   ;;  %s5476_s6 = inlined_call_operand.vmem [shape: f32[2,1,128], index: 6, kind: input, shape index: {}]   ;;  %s5477_s7 = inlined_call_operand.hbm [shape: bf16[2,128,512], index: 7, kind: input, shape index: {}]   ;;  %s5478_s8 = inlined_call_operand.vmem [shape: f32[2,1,512], index: 8, kind: input, shape index: {}]   ;;  %s5479_s9 = inlined_call_operand.hbm [shape: bf16[2,128,512], index: 9, kind: input, shape index: {}]   ;;  %s5480_s10 = inlined_call_operand.hbm [shape: bf16[2,128,256], index: 10, kind: input, shape index: {}]   ;;  %s5481_s11 = inlined_call_operand.hbm [shape: bf16[2,256,128], index: 11, kind: input, shape index: {}]   ;;  %s5482_s12 = inlined_call_operand.vmem [shape: f32[2,1,128], index: 12, kind: input, shape index: {}]   ;;  %s5483_s13 = inlined_call_operand.hbm [shape: bf16[2,128,384], index: 13, kind: input, shape index: {}]   ;;  %s5484_s14 = inlined_call_operand.vmem [shape: f32[2,1,384], index: 14, kind: input, shape index: {}]   ;;  %s5485_s15 = inlined_call_operand.hbm [shape: f32[16,128], index: 15, kind: output, shape index: {0}]   ;;  %s5486_s16 = inlined_call_operand.hbm [shape: f32[16,384], index: 16, kind: output, shape index: {1}]  }
   0x1   :  { %5542 = sst [smem:[#allocation63_spill]] %s5470_s0 }
   0x2   :  { %5543 = sst [smem:[#allocation64_spill]] %s5471_s1 }
   0x3   :  { %5544 = sst [smem:[#allocation65_spill]] %s5472_s2 }
   0x4   :  { %5545 = sst [smem:[#allocation66_spill]] %s5474_s4 }
   0x5   :  { %5546 = sst [smem:[#allocation67_spill]] %s5475_s5 }
   0x6   :  { %5547 = sst [smem:[#allocation68_spill]] %s5477_s7 }
   0x7   :  { %5548 = sst [smem:[#allocation69_spill]] %s5479_s9 }
   0x8   :  { %5549 = sst [smem:[#allocation70_spill]] %s5482_s12 }
   0x9   :  { %5550 = sst [smem:[#allocation71_spill]] %s5484_s14 }
   0xa   :  { %5551 = sst [smem:[#allocation72_spill]] %s5485_s15 }
   0xb   :  { %5552 = sst [smem:[#allocation73_spill]] %s5486_s16 }
   0xc   :  { %22 = vsyncpa [#allocation3], 0 }
   0xd   :  { %23 = vsyncpa [#allocation6], 0 }
   0xe   :  { %25 = vsyncpa [#allocation6 + $0x1], 0 }
   0xf   :  { %26 = vsyncpa [#allocation9], 0 }
  0x10   :  { %28 = vsyncpa [#allocation9 + $0x1], 0 }
  0x11   :  { %29 = vsyncpa [#allocation12], 0 }
  0x12   :  { %31 = vsyncpa [#allocation12 + $0x1], 0 }
  0x13   :  { %32 = vsyncpa [#allocation4], 0 }
  0x14   :  { %33 = vsyncpa [#allocation16], 0  ;;  %s4279_s21 = smov 0   ;;  %s4281_s22 = smov 0  }
  0x15   :  { %s4283_s23 = smov 0   ;;  %s4285_s24 = smov 0  }
  0x16 LB: > { %5553 = sst [smem:[#allocation23_spill]] %s4161_s23  ;;  %s4300_s25 = sadd.s32 1, %s4165_s24   ;;  %s4165_s24 = sphi %s4285_s24, %s5687_s24   ;;  %s4161_s23 = sphi %s4283_s23, %s5689_s23   ;;  %s4157_s22 = sphi %s4281_s22, %s5691_s22   ;;  %s4153_s21 = sphi %s4279_s21, %s5690_s21  }
  0x17   : > { %5554 = sst [smem:[#allocation24_spill]] %s4300_s25  ;;  %s151_s26 = sadd.s32 1, %s4161_s23 }
  0x18   : > { %s148_s27 = ssub.s32 %s4165_s24, %s4300_s25  ;;  %p158_p0 = scmp.ne.s32.totalorder %s4161_s23, %s4157_s22 }
  0x19   : > { %p149_p1 = scmp.eq.s32.totalorder %s148_s27, 0  ;;  %p159_p2 = scmp.eq.s32.totalorder %s4165_s24, 0 }
  0x1a   : > { %p3581_p3 = scmp.lt.s32.totalorder %s4165_s24, 2  ;;  %s4313_s29 = sand.u32 1, %s4165_s24  }
  0x1b   : > { %s4310_s28 = scalar_select %p149_p1, %s4161_s23, %s151_s26  }
  0x1c   : > { %p160_p4 = por %p159_p2, %p158_p0  ;;  %s4316_s30 = sand.u32 1, %s4161_s23  }
  0x1d   : > { %5555 = sst [smem:[#allocation25_spill]] %s4310_s28  ;;  %s3220_s0 = sshll.u32 %s4316_s30, 6 }
  0x1e   : > { %s3421_s17 = sshll.u32 %s4165_s24, 10  ;;  %s5556_s5 = sld [smem:[#allocation67_spill]] }
  0x1f   : > { %s493_s26 = scalar_lea.vmem [#allocation5], %s3220_s0  ;;  %p4325_p5 = pnand %p3581_p3, %p160_p4 }
  0x20   : > { %s500_s27 = sshll.u32 %s493_s26, 4  ;;  %s4329_s27 = int_to_ptr.vmem [resolvable:$true] %s500_s27 }
  0x21   : > { %s5557_s28 = scalar_select %p4325_p5, 1, 0 }
  0x22   : > { %p4336_p7 = pneg %p4325_p5 }
  0x24   : > { %s4323_s20 = scalar_lea.hbm %s5556_s5, %s3421_s17  ;;  %s3856_s19 = scalar_lea.hbm %s5556_s5, 2048 }
  0x25   : > { %s3851_s25 = scalar_lea.hbm %s4323_s20, 1024  ;;  %p3857_p10 = scmp.lt.u32.totalorder %s4323_s20, %s5556_s5 }
  0x26   : > { %p3852_p6 = scmp.ne.s32.totalorder %s4323_s20, %s3851_s25  ;;  %p3858_p11 = scmp.lt.u32.totalorder %s3856_s19, %s3851_s25 }
  0x27   : > { %s5558_s17 = scalar_select %p4336_p7, 1, 0 }
  0x28   : > { %p3854_p8 = pnand %p4336_p7, %p3852_p6  ;;  %p3859_p12 = por %p3858_p11, %p3857_p10 }
  0x29   : > { %p3860_p13 = scmp.lt.u32.totalorder %s3851_s25, %s4323_s20 }
  0x2a   : > { %p3855_p9 = pneg %p3854_p8 }
  0x2b   : > { %p3861_p0 = por %p3860_p13, %p3859_p12 }
  0x2d   : > { %p3862_p1 = pnand %p3861_p0, %p3855_p9 }
  0x2f   : > { %3865 = shalt.err (!%p3862_p1)
}
  0x30   : > { %s3866_s23 = scalar_lea.vmem %s4329_s27, 1024  ;;  %s4167_s0 = smov [#allocation5]  }
  0x31   : > { %p3867_p2 = scmp.ne.s32.totalorder %s4329_s27, %s3866_s23  ;;  %s3871_s18 = sshll.u32 %s4167_s0, 4  ;;  %s3872_s18 = int_to_ptr.vmem [resolvable:$false] %s3871_s18 }
  0x32   : > { %s3873_s15 = scalar_lea.vmem %s3872_s18, 2048  ;;  %p3874_p6 = scmp.lt.s32.totalorder %s4329_s27, %s3872_s18 }
  0x33   : > { %p3869_p3 = pnand %p3867_p2, %p4336_p7  ;;  %p3875_p8 = scmp.lt.s32.totalorder %s3873_s15, %s3866_s23 }
  0x35   : > { %p3870_p4 = pneg %p3869_p3  ;;  %p3876_p10 = por %p3875_p8, %p3874_p6 }
  0x37   : > { %p3877_p11 = pnand %p3876_p10, %p3870_p4 }
  0x39   : > { %3880 = shalt.err (!%p3877_p11)
}
  0x3a   : > { %s5495_s25 = smov 64   ;;  %s5496_s19 = smov 4  }
  0x3b   : > { %s5559_s26 = scalar_lea.sflag [#allocation6], %s4313_s29  ;;  %s3223_s23 = sshll.u32 %s4316_s30, 8 }
  0x3c   : > { %3564 = dma.hbm_to_vmem [thread:$0]  (!%p4325_p5), %s4323_s20, 1024, %s4329_s27, %s5559_s26, %s5495_s25, %s5495_s25, %s5496_s19  }
  0x3d   : > { %s3422_s0 = sshll.u32 %s4165_s24, 12  ;;  %s5560_s7 = sld [smem:[#allocation68_spill]] }
  0x3e   : > { %s520_s16 = scalar_lea.vmem [#allocation7], %s3223_s23  ;;  %s5561_s9 = sld [smem:[#allocation69_spill]] }
  0x3f   : > { %s527_s1 = sshll.u32 %s520_s16, 4  ;;  %s548_s20 = scalar_lea.vmem [#allocation8], %s3223_s23  ;;  %s4371_s1 = int_to_ptr.vmem [resolvable:$true] %s527_s1 }
  0x40   : > { %s555_s27 = sshll.u32 %s548_s20, 4  ;;  %s3229_s26 = sshll.u32 %s4316_s30, 7  ;;  %s4378_s27 = int_to_ptr.vmem [resolvable:$true] %s555_s27 }
  0x41   : > { %s5497_s18 = scalar_lea.sflag [#allocation9], %s4313_s29 }
  0x43   : > { %s4369_s5 = scalar_lea.hbm %s5560_s7, %s3422_s0 }
  0x44   : > { %s4376_s14 = scalar_lea.hbm %s5561_s9, %s3422_s0  ;;  %s3886_s2 = scalar_lea.hbm %s5561_s9, 8192 }
  0x45   : > { %s3881_s15 = scalar_lea.hbm %s4376_s14, 4096  ;;  %p3887_p0 = scmp.lt.u32.totalorder %s4376_s14, %s5561_s9 }
  0x46   : > { %p3882_p9 = scmp.ne.s32.totalorder %s4376_s14, %s3881_s15  ;;  %p3888_p1 = scmp.lt.u32.totalorder %s3886_s2, %s3881_s15 }
  0x47   : > { %p3890_p3 = scmp.lt.u32.totalorder %s3881_s15, %s4376_s14 }
  0x48   : > { %p3884_p12 = pnand %p3882_p9, %p4336_p7  ;;  %p3889_p2 = por %p3888_p1, %p3887_p0 }
  0x4a   : > { %p3885_p13 = pneg %p3884_p12  ;;  %p3891_p4 = por %p3890_p3, %p3889_p2 }
  0x4c   : > { %p3892_p6 = pnand %p3891_p4, %p3885_p13 }
  0x4e   : > { %3895 = shalt.err (!%p3892_p6)
}
  0x4f   : > { %s3896_s23 = scalar_lea.vmem %s4378_s27, 4096  ;;  %s4170_s25 = smov [#allocation8]  }
  0x50   : > { %p3897_p8 = scmp.ne.s32.totalorder %s4378_s27, %s3896_s23  ;;  %s3901_s20 = sshll.u32 %s4170_s25, 4  ;;  %s3902_s20 = int_to_ptr.vmem [resolvable:$false] %s3901_s20 }
  0x51   : > { %s3903_s16 = scalar_lea.vmem %s3902_s20, 8192  ;;  %p3904_p9 = scmp.lt.s32.totalorder %s4378_s27, %s3902_s20 }
  0x52   : > { %p3899_p10 = pnand %p3897_p8, %p4336_p7  ;;  %p3905_p12 = scmp.lt.s32.totalorder %s3903_s16, %s3896_s23 }
  0x54   : > { %p3900_p11 = pneg %p3899_p10  ;;  %p3906_p0 = por %p3905_p12, %p3904_p9 }
  0x56   : > { %p3907_p1 = pnand %p3906_p0, %p3900_p11 }
  0x58   : > { %3910 = shalt.err (!%p3907_p1)
}
  0x59   : > { %s4171_s15 = smov 256   ;;  %s4172_s2 = smov 16  }
  0x5a   : > { %3570 = dma.hbm_to_vmem [thread:$0]  (!%p4325_p5), %s4376_s14, 4096, %s4378_s27, %s5497_s18, %s4171_s15, %s4171_s15, %s4172_s2  }
  0x5b   : > { %s3424_s4 = sshll.u32 %s4165_s24, 11  ;;  %s569_s20 = scalar_lea.vmem [#allocation10], %s3229_s26 }
  0x5c   : > { %s4412_s25 = scalar_lea.hbm %s5480_s10, %s3424_s4  ;;  %s576_s16 = sshll.u32 %s569_s20, 4  ;;  %s4416_s16 = int_to_ptr.vmem [resolvable:$true] %s576_s16 }
  0x5d   : > { %s4421_s12 = scalar_lea.hbm %s5481_s11, %s3424_s4  ;;  %s590_s14 = scalar_lea.vmem [#allocation11], %s3229_s26 }
  0x5e   : > { %s597_s27 = sshll.u32 %s590_s14, 4  ;;  %s5502_s0 = scalar_lea.sflag [#allocation12], %s4313_s29  ;;  %s4425_s27 = int_to_ptr.vmem [resolvable:$true] %s597_s27 }
  0x5f   : > { %s3911_s23 = scalar_lea.hbm %s4421_s12, 2048  ;;  %s3916_s9 = scalar_lea.hbm %s5481_s11, 4096 }
  0x60   : > { %p3912_p13 = scmp.ne.s32.totalorder %s4421_s12, %s3911_s23  ;;  %p3917_p4 = scmp.lt.u32.totalorder %s4421_s12, %s5481_s11 }
  0x61   : > { %p3918_p6 = scmp.lt.u32.totalorder %s3916_s9, %s3911_s23  ;;  %p3920_p10 = scmp.lt.u32.totalorder %s3911_s23, %s4421_s12 }
  0x62   : > { %p3914_p2 = pnand %p3912_p13, %p4336_p7 }
  0x63   : > { %p3919_p8 = por %p3918_p6, %p3917_p4 }
  0x64   : > { %p3915_p3 = pneg %p3914_p2 }
  0x65   : > { %p3921_p11 = por %p3920_p10, %p3919_p8 }
  0x67   : > { %p3922_p9 = pnand %p3921_p11, %p3915_p3 }
  0x69   : > { %3925 = shalt.err (!%p3922_p9)
}
  0x6a   : > { %s3926_s26 = scalar_lea.vmem %s4425_s27, 2048  ;;  %s4173_s18 = smov [#allocation11]  }
  0x6b   : > { %p3927_p12 = scmp.ne.s32.totalorder %s4425_s27, %s3926_s26  ;;  %s3931_s14 = sshll.u32 %s4173_s18, 4  ;;  %s3932_s14 = int_to_ptr.vmem [resolvable:$false] %s3931_s14 }
  0x6c   : > { %s3933_s20 = scalar_lea.vmem %s3932_s14, 4096  ;;  %p3934_p13 = scmp.lt.s32.totalorder %s4425_s27, %s3932_s14 }
  0x6d   : > { %p3929_p0 = pnand %p3927_p12, %p4336_p7  ;;  %p3935_p2 = scmp.lt.s32.totalorder %s3933_s20, %s3926_s26 }
  0x6f   : > { %p3930_p1 = pneg %p3929_p0  ;;  %p3936_p4 = por %p3935_p2, %p3934_p13 }
  0x71   : > { %p3937_p6 = pnand %p3936_p4, %p3930_p1 }
  0x73   : > { %3940 = shalt.err (!%p3937_p6)
}
  0x74   : > { %s5562_s23 = smov 4   ;;  %s5563_s9 = smov 64  }
  0x75   : > { %3576 = dma.hbm_to_vmem [thread:$0]  (!%p4325_p5), %s4421_s12, 2048, %s4425_s27, %s5502_s0, %s5563_s9, %s5563_s9, %s5562_s23  }
  0x76   : > { %s4455_s19 = sadd.s32 4294967295, %s4165_s24   ;;  %p164_p3 = scmp.ne.s32.totalorder %s4157_s22, %s4153_s21 }
  0x77   : > { %p5498_p8 = scmp.eq.s32.totalorder %s4455_s19, 0  ;;  %p3217_p10 = scmp.ge.s32.totalorder %s4165_s24, 1 }
  0x78   : > { %p451_p11 = scmp.lt.s32.totalorder %s4165_s24, 3  ;;  %s4174_s12 = smov [#allocation2]  }
  0x79   : > { %p4465_p12 = por %p5498_p8, %p164_p3  ;;  %s472_s27 = sshll.u32 %s4174_s12, 4  ;;  %s4473_s27 = int_to_ptr.vmem [resolvable:$true] %s472_s27 }
  0x7a   : > { %p4469_p0 = pnand %p3217_p10, %p451_p11  ;;  %s3941_s21 = scalar_lea.hbm %s4369_s5, 4096 }
  0x7b   : > { %s5564_s4 = scalar_select %p4465_p12, 1, 0 }
  0x7c   : > { %s5565_s26 = scalar_select %p4469_p0, 1, 0 }
  0x7d   : > { %p3942_p13 = scmp.ne.s32.totalorder %s4369_s5, %s3941_s21  ;;  %s3946_s20 = scalar_lea.hbm %s5560_s7, 8192 }
  0x7e   : > { %p3947_p6 = scmp.lt.u32.totalorder %s4369_s5, %s5560_s7  ;;  %p3948_p3 = scmp.lt.u32.totalorder %s3946_s20, %s3941_s21 }
  0x7f   : > { %p3944_p2 = pnand %p3942_p13, %p4336_p7  ;;  %p3950_p11 = scmp.lt.u32.totalorder %s3941_s21, %s4369_s5 }
  0x80   : > { %p3949_p10 = por %p3948_p3, %p3947_p6 }
  0x81   : > { %p3945_p4 = pneg %p3944_p2 }
  0x82   : > { %p3951_p9 = por %p3950_p11, %p3949_p10 }
  0x84   : > { %p3952_p8 = pnand %p3951_p9, %p3945_p4 }
  0x86   : > { %3955 = shalt.err (!%p3952_p8)
}
  0x87   : > { %s3956_s12 = scalar_lea.vmem %s4371_s1, 4096  ;;  %s4175_s18 = smov [#allocation7]  }
  0x88   : > { %p3957_p13 = scmp.ne.s32.totalorder %s4371_s1, %s3956_s12  ;;  %s3961_s14 = sshll.u32 %s4175_s18, 4  ;;  %s3962_s14 = int_to_ptr.vmem [resolvable:$false] %s3961_s14 }
  0x89   : > { %s3963_s23 = scalar_lea.vmem %s3962_s14, 8192  ;;  %p3964_p12 = scmp.lt.s32.totalorder %s4371_s1, %s3962_s14 }
  0x8a   : > { %p3959_p2 = pnand %p3957_p13, %p4336_p7  ;;  %p3965_p0 = scmp.lt.s32.totalorder %s3963_s23, %s3956_s12 }
  0x8c   : > { %p3960_p1 = pneg %p3959_p2  ;;  %p3966_p6 = por %p3965_p0, %p3964_p12 }
  0x8e   : > { %p3967_p3 = pnand %p3966_p6, %p3960_p1 }
  0x90   : > { %3970 = shalt.err (!%p3967_p3)
}
  0x91   : > { %s5566_s21 = scalar_lea.sflag [#allocation6], %s4313_s29  ;;  %p5567_p8 = scmp.eq.s32.totalorder %s4455_s19, 0 }
  0x92   : > { %3567 = dma.hbm_to_vmem [thread:$0]  (!%p4325_p5), %s4369_s5, 4096, %s4371_s1, %s5566_s21, %s4171_s15, %s4171_s15, %s4172_s2  }
  0x93   : > { %p5568_p9 = scmp.ne.s32.totalorder %s5565_s26, 0  ;;  %s3529_s9 = smul.u32 192, %s4316_s30 }
  0x94   : > { %s3530_s12 = smul.u32 3072, %s4165_s24  ;;  %s3971_s23 = scalar_lea.hbm %s5473_s3, 2304 }
  0x95   : > { %p5569_p4 = pneg %p5568_p9  ;;  %p3972_p0 = scmp.ne.s32.totalorder %s5473_s3, %s3971_s23 }
  0x96   : > { %p3978_p13 = scmp.lt.u32.totalorder %s3971_s23, %s5473_s3 }
  0x97   : > { %p4508_p12 = pnand %p5569_p4, %p5567_p8 }
  0x99   : > { %p3973_p1 = pneg %p4508_p12 }
  0x9b   : > { %p3974_p10 = pnand %p3973_p1, %p3972_p0 }
  0x9d   : > { %p3975_p11 = pneg %p3974_p10 }
  0x9f   : > { %p3980_p2 = pnand %p3978_p13, %p3975_p11 }
  0xa1   : > { %3983 = shalt.err (!%p3980_p2)
}
  0xa2   : > { %s3984_s15 = scalar_lea.vmem %s4473_s27, 2304  ;;  %p3992_p4 = scmp.lt.s32.totalorder %s4473_s27, %s4473_s27 }
  0xa3   : > { %p3985_p6 = scmp.ne.s32.totalorder %s4473_s27, %s3984_s15  ;;  %p3993_p9 = scmp.lt.s32.totalorder %s3984_s15, %s3984_s15 }
  0xa5   : > { %p3987_p3 = pnand %p3985_p6, %p3973_p1  ;;  %p3994_p5 = por %p3993_p9, %p3992_p4 }
  0xa7   : > { %p3988_p8 = pneg %p3987_p3 }
  0xa9   : > { %p3995_p7 = pnand %p3994_p5, %p3988_p8 }
  0xab   : > { %3998 = shalt.err (!%p3995_p7)
}
  0xac   : > { %s4176_s7 = smov 384   ;;  %s4177_s2 = smov 24  }
  0xad   : > { %3560 = dma.hbm_to_vmem [thread:$0]  (!%p4508_p12), %s5473_s3, 2304, %s4473_s27, [#allocation3], %s4176_s7, %s4176_s7, %s4177_s2  }
  0xae   : > { %s3999_s18 = scalar_lea.hbm %s4412_s25, 2048  ;;  %p5571_p1 = scmp.ne.s32.totalorder %s5558_s17, 0 }
  0xaf   : > { %p4000_p0 = scmp.ne.s32.totalorder %s4412_s25, %s3999_s18  ;;  %s4004_s1 = scalar_lea.hbm %s5480_s10, 4096 }
  0xb0   : > { %p4005_p7 = scmp.lt.u32.totalorder %s4412_s25, %s5480_s10  ;;  %p4006_p10 = scmp.lt.u32.totalorder %s4004_s1, %s3999_s18 }
  0xb1   : > { %p4002_p9 = pnand %p4000_p0, %p5571_p1  ;;  %p4008_p13 = scmp.lt.u32.totalorder %s3999_s18, %s4412_s25 }
  0xb2   : > { %p4007_p11 = por %p4006_p10, %p4005_p7 }
  0xb3   : > { %p4003_p5 = pneg %p4002_p9 }
  0xb4   : > { %p4009_p2 = por %p4008_p13, %p4007_p11 }
  0xb6   : > { %p4010_p6 = pnand %p4009_p2, %p4003_p5 }
  0xb8   : > { %4013 = shalt.err (!%p4010_p6)
}
  0xb9   : > { %s4014_s27 = scalar_lea.vmem %s4416_s16, 2048  ;;  %s4178_s20 = smov [#allocation10]  }
  0xba   : > { %p4015_p12 = scmp.ne.s32.totalorder %s4416_s16, %s4014_s27  ;;  %s4019_s7 = sshll.u32 %s4178_s20, 4  ;;  %s4020_s7 = int_to_ptr.vmem [resolvable:$false] %s4019_s7 }
  0xbb   : > { %s4021_s2 = scalar_lea.vmem %s4020_s7, 4096  ;;  %p4022_p4 = scmp.lt.s32.totalorder %s4416_s16, %s4020_s7 }
  0xbc   : > { %p4017_p3 = pnand %p4015_p12, %p5571_p1  ;;  %p4023_p0 = scmp.lt.s32.totalorder %s4021_s2, %s4014_s27 }
  0xbe   : > { %p4018_p8 = pneg %p4017_p3  ;;  %p4024_p9 = por %p4023_p0, %p4022_p4 }
  0xc0   : > { %p4025_p7 = pnand %p4024_p9, %p4018_p8 }
  0xc2   : > { %4028 = shalt.err (!%p4025_p7)
}
  0xc3   : > { %s4179_s0 = smov 128   ;;  %s4180_s21 = smov 8  }
  0xc4   : > { %p5572_p5 = scmp.ne.s32.totalorder %s5557_s28, 0  ;;  %s5573_s18 = scalar_lea.sflag [#allocation9], %s4313_s29 }
  0xc5   : > { %s4563_s1 = scalar_lea.hbm %s5483_s13, %s3530_s12  ;;  %s617_s5 = scalar_lea.vmem [#allocation13], %s3529_s9 }
  0xc6   : > { %3573 = dma.hbm_to_vmem [thread:$0]  (!%p5572_p5), %s4412_s25, 2048, %s4416_s16, %s5573_s18, %s4179_s0, %s4179_s0, %s4180_s21  }
  0xc7   : > { %s624_s15 = sshll.u32 %s617_s5, 4  ;;  %s4029_s27 = scalar_lea.hbm %s4563_s1, 3072  ;;  %s4567_s15 = int_to_ptr.vmem [resolvable:$true] %s624_s15 }
  0xc8   : > { %p4030_p10 = scmp.ne.s32.totalorder %s4563_s1, %s4029_s27  ;;  %s4034_s16 = scalar_lea.hbm %s5483_s13, 6144 }
  0xc9   : > { %p4035_p2 = scmp.lt.u32.totalorder %s4563_s1, %s5483_s13  ;;  %p4036_p6 = scmp.lt.u32.totalorder %s4034_s16, %s4029_s27 }
  0xca   : > { %p4032_p11 = pnand %p4030_p10, %p5571_p1  ;;  %p4038_p3 = scmp.lt.u32.totalorder %s4029_s27, %s4563_s1 }
  0xcb   : > { %p4037_p12 = por %p4036_p6, %p4035_p2 }
  0xcc   : > { %p4033_p13 = pneg %p4032_p11 }
  0xcd   : > { %p4039_p8 = por %p4038_p3, %p4037_p12 }
  0xcf   : > { %p4040_p4 = pnand %p4039_p8, %p4033_p13 }
  0xd1   : > { %4043 = shalt.err (!%p4040_p4)
}
  0xd2   : > { %s4044_s30 = scalar_lea.vmem %s4567_s15, 3072  ;;  %s4181_s9 = smov [#allocation13]  }
  0xd3   : > { %p4045_p0 = scmp.ne.s32.totalorder %s4567_s15, %s4044_s30  ;;  %s4049_s7 = sshll.u32 %s4181_s9, 4  ;;  %s4050_s7 = int_to_ptr.vmem [resolvable:$false] %s4049_s7 }
  0xd4   : > { %s4051_s2 = scalar_lea.vmem %s4050_s7, 6144  ;;  %p4052_p10 = scmp.lt.s32.totalorder %s4567_s15, %s4050_s7 }
  0xd5   : > { %p4047_p9 = pnand %p4045_p0, %p5571_p1  ;;  %p4053_p11 = scmp.lt.s32.totalorder %s4051_s2, %s4044_s30 }
  0xd7   : > { %p4048_p7 = pneg %p4047_p9  ;;  %p4054_p2 = por %p4053_p11, %p4052_p10 }
  0xd9   : > { %p4055_p6 = pnand %p4054_p2, %p4048_p7 }
  0xdb   : > { %4058 = shalt.err (!%p4055_p6)
}
  0xdc   : > { %s4182_s0 = smov 192   ;;  %s4183_s21 = smov 12  }
  0xdd   : > { %s5574_s18 = scalar_lea.sflag [#allocation12], %s4313_s29  ;;  %p5575_p1 = scmp.ne.s32.totalorder %s5565_s26, 0 }
  0xde   : > { %3579 = dma.hbm_to_vmem [thread:$0]  (!%p5572_p5), %s4563_s1, 3072, %s4567_s15, %s5574_s18, %s4182_s0, %s4182_s0, %s4183_s21  }
  0xdf   : > { %643 = sbr.rel (%p5575_p1) target bundleno = 2103 (0x837), region = 80 }
  0xe6   : > { %p5576_p13 = scmp.eq.s32.totalorder %s4455_s19, 0 }
  0xe8   : > { %4128 = dma.done.wait (%p5576_p13), [#allocation3], 2304   ;;  %p5577_p12 = pmov %p5576_p13 }
  0xe9   : > { %s649_s17 = sand.u32 1, %s4455_s19   ;;  %s651_s14 = sand.u32 1, %s4157_s22  }
  0xea   : > { %4130 = vsyncadd (%p5577_p12), [#allocation3], 4294964992  ;;  %s3238_s23 = sshll.u32 %s651_s14, 6  ;;  %s650_s5 = scalar_lea.sflag [#allocation6], %s649_s17 }
  0xeb   : > { %s4600_s27 = scalar_lea.vmem [#allocation5], %s3238_s23  ;;  %p5578_p3 = scmp.ne.s32.totalorder %s5564_s4, 0 }
  0xed   : > { %4132 = dma.done.wait (%p5578_p3), %s650_s5, 5120  }
  0xee   : > { %4134 = vsyncadd (%p5578_p3), %s650_s5, 4294962176  ;;  %s3239_s28 = sshll.u32 %s651_s14, 8  ;;  %s668_s26 = scalar_lea.sflag [#allocation9], %s649_s17 }
  0xef   : > { %s4606_s29 = scalar_lea.vmem [#allocation7], %s3239_s28  ;;  %s4608_s1 = scalar_lea.vmem [#allocation8], %s3239_s28 }
  0xf0   : > { %4136 = dma.done.wait (%p5578_p3), %s668_s26, 6144  }
  0xf1   : > { %4138 = vsyncadd (%p5578_p3), %s668_s26, 4294961152  ;;  %s3241_s15 = sshll.u32 %s651_s14, 7  ;;  %s686_s25 = scalar_lea.sflag [#allocation12], %s649_s17 }
  0xf2   : > { %s4614_s24 = scalar_lea.vmem [#allocation10], %s3241_s15  ;;  %s4616_s16 = scalar_lea.vmem [#allocation11], %s3241_s15 }
  0xf3   : > { %4140 = dma.done.wait (%p5578_p3), %s686_s25, 5120  }
  0xf4   : > { %4142 = vsyncadd (%p5578_p3), %s686_s25, 4294962176  ;;  %s3531_s12 = smul.u32 192, %s651_s14  ;;  %p781_p5 = scmp.lt.s32.totalorder %s4455_s19, 1 }
  0xf5   : > { %s5579_s14 = sld [smem:[#allocation70_spill]]  ;;  %s5580_s15 = sld [smem:[#allocation71_spill]] }
  0xf6   : > { %s4624_s20 = scalar_select %p781_p5, %s4455_s19, 1 }
  0xf7   : > { %s4646_s30 = scalar_lea.vmem [#allocation13], %s3531_s12  ;;  %p5581_p8 = scmp.ne.s32.totalorder %s4455_s19, 0 }
  0xf8   : > { %s3243_s2 = sshll.u32 %s4624_s20, 2  ;;  %s3532_s5 = smul.u32 3, %s4624_s20  ;;  %v4184_v2 = vmov (!%p5581_p8), 0.0  }
  0xf9   : > { %s4634_s4 = scalar_lea.vmem %s5478_s8, %s3243_s2  ;;  %799 = sbr.rel (%p5581_p8) target bundleno = 258 (0x102), region = 112  ;;  %804 = vst [vmem:[#allocation15] sm:$0xff] (!%p5581_p8), %v4184_v2  ;;  %805 = vst [vmem:[#allocation15 + $0x8] sm:$0xff] (!%p5581_p8), %v4184_v2 }
  0xfa   : > { %s5582_s0 = sld [smem:[#allocation65_spill]] (!%p5581_p8)  ;;  %806 = vst [vmem:[#allocation15 + $0x10] sm:$0xff] (!%p5581_p8), %v4184_v2  ;;  %807 = vst [vmem:[#allocation15 + $0x18] sm:$0xff] (!%p5581_p8), %v4184_v2 }
  0xfb   : > { %s790_s23 = scalar_lea.vmem %s5579_s14, %s4624_s20  ;;  %s4644_s25 = scalar_lea.vmem %s5580_s15, %s3532_s5  ;;  %808 = vst [vmem:[#allocation15 + $0x20] sm:$0xff] (!%p5581_p8), %v4184_v2  ;;  %809 = vst [vmem:[#allocation15 + $0x28] sm:$0xff] (!%p5581_p8), %v4184_v2 }
 0x100   : > { %v800_v0 = vld [vmem:[%s5582_s0] sm:$0xff]  ;;  %v801_v1 = vld [vmem:[%s5582_s0 + $0x8] sm:$0xff] }
 0x101   : > { %802 = vst [vmem:[#allocation14] sm:$0xff] %v800_v0  ;;  %803 = vst [vmem:[#allocation14 + $0x8] sm:$0xff] %v801_v1 }
 0x102 PF: > { %v3640_v3 = vld [vmem:[%s4600_s27] sm:$0xff]   ;;  %v5510_v4 = vmov 0.0   ;;  %v3641_v5 = vld [vmem:[%s4600_s27 + $0x8] sm:$0xff]   ;;  %vm4186_vm0 = vmmov 0   ;;  %v3642_v6 = vld [vmem:[%s4600_s27 + $0x10] sm:$0xff]   ;;  %v5512_v47 = vmov 0   ;;  %s5583_s7 = scalar_lea.vmem %s5476_s6, %s4624_s20  ;;  %v980_v2 = vlaneseq }
 0x103   : > { %3473 = vmatprep.subr.bf16.mxu0 %v5510_v4  ;;  %3489 = vmatprep.mubr.msk.bf16.mxu0 %vm4186_vm0, %v5510_v4  ;;  %v3643_v7 = vld [vmem:[%s4600_s27 + $0x18] sm:$0xff]   ;;  %v3644_v8 = vld [vmem:[%s4600_s27 + $0x20] sm:$0xff]   ;;  %v3645_v9 = vld [vmem:[%s4600_s27 + $0x28] sm:$0xff]   ;;  %s5587_s18 = sld [smem:[#allocation63_spill]]  ;;  %vm1295_vm1 = vcmask 130048   ;;  %s5674_s26 = sld [smem:[#allocation64_spill]] }
 0x104   : > { %3474 = vmatpush3.bf16.msra.mxu0 %v3640_v3  ;;  %v3646_v10 = vld [vmem:[%s4600_s27 + $0x30] sm:$0xff]   ;;  %v3647_v11 = vld [vmem:[%s4600_s27 + $0x38] sm:$0xff]   ;;  %1192 = vmatprep.mubr.bf16.mxu1 %v5512_v47  ;;  %v4715_v3 = vshrl.u32 %v980_v2, 7  ;;  %vm2197_vm2 = vcmask 392192   ;;  %s4188_s20 = smov [#allocation15]   ;;  %p3583_p4 = scmp.eq.s32.totalorder %s4455_s19, 1 }
 0x105   : > { %3475 = vmatprep.subr.bf16.mxu0 %v5510_v4  ;;  %v3648_v15 = vld [vmem:[%s4606_s29 + $0x4] ss:$16 sps:$4 sm:$0xff]   ;;  %v3652_v16 = vld [vmem:[%s4606_s29 + $0xc] ss:$16 sps:$4 sm:$0xff]   ;;  %v3650_v17 = vld [vmem:[%s4606_s29 + $0x8] ss:$16 sps:$4 sm:$0xff]  }
 0x106   : > { %v3653_v18 = vld [vmem:[%s4606_s29] ss:$16 sps:$4 sm:$0xff]   ;;  %1160 = vmatprep.subr.bf16.mxu1 %v3648_v15  ;;  %v3654_v19 = vld [vmem:[%s4606_s29 + $0x24] ss:$16 sps:$4 sm:$0xff]   ;;  %v3658_v20 = vld [vmem:[%s4606_s29 + $0x2c] ss:$16 sps:$4 sm:$0xff]  }
 0x107   : > { %1161 = vmatpush1.bf16.msra.mxu1 %v3653_v18  ;;  %v3656_v21 = vld [vmem:[%s4606_s29 + $0x28] ss:$16 sps:$4 sm:$0xff]   ;;  %v3659_v22 = vld [vmem:[%s4606_s29 + $0x20] ss:$16 sps:$4 sm:$0xff]   ;;  %v3660_v23 = vld [vmem:[%s4606_s29 + $0x44] ss:$16 sps:$4 sm:$0xff]  }
 0x108   : > { %3476 = vmatpush3.bf16.msra.mxu0 %v3641_v5  ;;  %v810_v12 = vld [vmem:[#allocation14] sm:$0xff]  ;;  %v811_v13 = vld [vmem:[#allocation14 + $0x8] sm:$0xff]  ;;  %1162 = vmatprep.subr.bf16.mxu1 %v3654_v19  ;;  %v3245_v48 = vld [vmem:[%s5583_s7] ss:$0 sm:$0xff]  ;;  %5584 = vst [vmem:[#allocation26_spill] sm:$0xff] %v4715_v3  ;;  %v5509_v5 = vsub.s32 0, %v4715_v3 }
 0x109   : > { %3477 = vmatprep.subr.bf16.mxu0 %v5510_v4  ;;  %v818_v14 = vpack.c.bf16 %v811_v13, %v810_v12  ;;  %v3664_v24 = vld [vmem:[%s4606_s29 + $0x4c] ss:$16 sps:$4 sm:$0xff]   ;;  %v3662_v25 = vld [vmem:[%s4606_s29 + $0x48] ss:$16 sps:$4 sm:$0xff]   ;;  %v3665_v26 = vld [vmem:[%s4606_s29 + $0x40] ss:$16 sps:$4 sm:$0xff]  }
 0x10a   : > { %v3666_v27 = vld [vmem:[%s4606_s29 + $0x64] ss:$16 sps:$4 sm:$0xff]   ;;  %v3670_v28 = vld [vmem:[%s4606_s29 + $0x6c] ss:$16 sps:$4 sm:$0xff]   ;;  %v3668_v29 = vld [vmem:[%s4606_s29 + $0x68] ss:$16 sps:$4 sm:$0xff]  }
 0x10b   : > { %1163 = vmatpush1.bf16.msra.mxu1 %v3659_v22  ;;  %v3671_v30 = vld [vmem:[%s4606_s29 + $0x60] ss:$16 sps:$4 sm:$0xff]   ;;  %v3672_v31 = vld [vmem:[%s4606_s29 + $0x84] ss:$16 sps:$4 sm:$0xff]   ;;  %v3676_v32 = vld [vmem:[%s4606_s29 + $0x8c] ss:$16 sps:$4 sm:$0xff]  }
 0x10c   : > { %3478 = vmatpush3.bf16.msra.mxu0 %v3642_v6  ;;  %1164 = vmatprep.subr.bf16.mxu1 %v3660_v23  ;;  %v3674_v33 = vld [vmem:[%s4606_s29 + $0x88] ss:$16 sps:$4 sm:$0xff]   ;;  %v3677_v34 = vld [vmem:[%s4606_s29 + $0x80] ss:$16 sps:$4 sm:$0xff]   ;;  %v3678_v35 = vld [vmem:[%s4606_s29 + $0xa4] ss:$16 sps:$4 sm:$0xff]  }
 0x10d   : > { %3479 = vmatprep.subr.bf16.mxu0 %v5510_v4  ;;  %v3682_v36 = vld [vmem:[%s4606_s29 + $0xac] ss:$16 sps:$4 sm:$0xff]   ;;  %v3680_v37 = vld [vmem:[%s4606_s29 + $0xa8] ss:$16 sps:$4 sm:$0xff]   ;;  %v3683_v38 = vld [vmem:[%s4606_s29 + $0xa0] ss:$16 sps:$4 sm:$0xff]  }
 0x10e   : > { %v3684_v39 = vld [vmem:[%s4606_s29 + $0xc4] ss:$16 sps:$4 sm:$0xff]   ;;  %v3688_v40 = vld [vmem:[%s4606_s29 + $0xcc] ss:$16 sps:$4 sm:$0xff]   ;;  %v3686_v41 = vld [vmem:[%s4606_s29 + $0xc8] ss:$16 sps:$4 sm:$0xff]  }
 0x10f   : > { %1165 = vmatpush1.bf16.msra.mxu1 %v3665_v26  ;;  %v3689_v42 = vld [vmem:[%s4606_s29 + $0xc0] ss:$16 sps:$4 sm:$0xff]   ;;  %v3690_v43 = vld [vmem:[%s4606_s29 + $0xe4] ss:$16 sps:$4 sm:$0xff]   ;;  %v3694_v44 = vld [vmem:[%s4606_s29 + $0xec] ss:$16 sps:$4 sm:$0xff]  }
 0x110   : > { %3480 = vmatpush3.bf16.msra.mxu0 %v3643_v7  ;;  %1166 = vmatprep.subr.bf16.mxu1 %v3666_v27  ;;  %v3692_v45 = vld [vmem:[%s4606_s29 + $0xe8] ss:$16 sps:$4 sm:$0xff]   ;;  %v3695_v46 = vld [vmem:[%s4606_s29 + $0xe0] ss:$16 sps:$4 sm:$0xff]   ;;  %v5507_v6 = vsub.s32 2, %v4715_v3  ;;  %s5589_s29 = sld [smem:[#allocation66_spill]] }
 0x111   : > { %3481 = vmatprep.subr.bf16.mxu0 %v5510_v4  ;;  %v978_v7 = vld [vmem:[%s4634_s4] sm:$0xf]  ;;  %v813_v26 = vld [vmem:[#allocation15 + $0x8] sm:$0xff] }
 0x112   : > { %v816_v27 = vld [vmem:[#allocation15 + $0x20] sm:$0xff] }
 0x113   : > { %1167 = vmatpush1.bf16.msra.mxu1 %v3671_v30  ;;  %v3732_v2 = vld [vmem:[%s4608_s1 + $0xa0] ss:$16 sps:$4 sm:$0xff]  }
 0x114   : > { %3482 = vmatpush3.bf16.msra.mxu0 %v3644_v8  ;;  %1168 = vmatprep.subr.bf16.mxu1 %v3672_v31  ;;  %v5508_v8 = vsub.s32 1, %v4715_v3 }
 0x115   : > { %3483 = vmatprep.subr.bf16.mxu0 %v5510_v4 }
 0x117   : > { %1169 = vmatpush1.bf16.msra.mxu1 %v3677_v34 }
 0x118   : > { %3484 = vmatpush3.bf16.msra.mxu0 %v3645_v9  ;;  %1170 = vmatprep.subr.bf16.mxu1 %v3678_v35  ;;  %v994_v9 = vsub.s32 3, %v4715_v3 }
 0x119   : > { %3485 = vmatprep.subr.bf16.mxu0 %v5510_v4 }
 0x11a   : > { %v995_v15 = vrot.slane %v978_v7, %v994_v9  ;;  %v3725_v9 = vld [vmem:[%s4608_s1 + $0x6c] ss:$16 sps:$4 sm:$0xff]  }
 0x11b   : > { %1171 = vmatpush1.bf16.msra.mxu1 %v3683_v38  ;;  %v4730_v38 = vld [vmem:[#allocation15 + $0x18] sm:$0xff] }
 0x11c   : > { %3486 = vmatpush3.bf16.msra.mxu0 %v3646_v10  ;;  %1172 = vmatprep.subr.bf16.mxu1 %v3684_v39  ;;  %v983_v10 = vrot.slane %v978_v7, %v5509_v5  ;;  %5586 = vst [vmem:[#allocation28_spill] sm:$0xff] %v4730_v38  ;;  %v3696_v39 = vld [vmem:[%s5587_s18] sm:$0xff]  }
 0x11d   : > { %3487 = vmatprep.subr.bf16.mxu0 %v5510_v4 }
 0x11f   : > { %1173 = vmatpush1.bf16.msra.mxu1 %v3689_v42  ;;  %v4740_v42 = vld [vmem:[#allocation15 + $0x28] sm:$0xff] }
 0x120   : > { %3488 = vmatpush3.bf16.msra.mxu0 %v3647_v11  ;;  %1174 = vmatprep.subr.bf16.mxu1 %v3690_v43  ;;  %v991_v11 = vrot.slane %v978_v7, %v5507_v6  ;;  %5588 = vst [vmem:[#allocation29_spill] sm:$0xff] %v4740_v42 }
 0x121   : > { %1203 = vmatprep.subr.bf16.mxu0 %v3652_v16 }
 0x123   : > { %3490 = vmatmul.mubr.bf16.vlgmr.msra.gmra.mrb[0].mxu0 %v818_v14  ;;  %1175 = vmatpush1.bf16.msra.mxu1 %v3695_v46  ;;  %v987_v14 = vrot.slane %v978_v7, %v5508_v8  ;;  %v3698_v46 = vld [vmem:[%s5587_s18 + $0x10] sm:$0xff]   ;;  %v3720_v7 = vld [vmem:[%s4608_s1 + $0x48] ss:$16 sps:$4 sm:$0xff]  }
 0x124   : > { %1204 = vmatpush1.bf16.msra.mxu0 %v3650_v17  ;;  %1235 = vmatprep.mubr.bf16.mxu0 %v5512_v47 }
 0x125   : > { %1205 = vmatprep.subr.bf16.mxu0 %v3658_v20 }
 0x128   : > { %1206 = vmatpush1.bf16.msra.mxu0 %v3656_v21 }
 0x129   : > { %1207 = vmatprep.subr.bf16.mxu0 %v3664_v24 }
 0x12c   : > { %1208 = vmatpush1.bf16.msra.mxu0 %v3662_v25 }
 0x12d   : > { %1209 = vmatprep.subr.bf16.mxu0 %v3670_v28 }
 0x130   : > { %1210 = vmatpush1.bf16.msra.mxu0 %v3668_v29 }
 0x131   : > { %1211 = vmatprep.subr.bf16.mxu0 %v3676_v32 }
 0x134   : > { %1212 = vmatpush1.bf16.msra.mxu0 %v3674_v33 }
 0x135   : > { %1213 = vmatprep.subr.bf16.mxu0 %v3682_v36  ;;  %v1251_v36 = vpack.c.bf16 %v816_v27, %v813_v26 }
 0x138   : > { %1214 = vmatpush1.bf16.msra.mxu0 %v3680_v37  ;;  %v4728_v37 = vld [vmem:[#allocation15] sm:$0xff] }
 0x139   : > { %1215 = vmatprep.subr.bf16.mxu0 %v3688_v40  ;;  %5585 = vst [vmem:[#allocation27_spill] sm:$0xff] %v4728_v37  ;;  %v4738_v40 = vld [vmem:[%s5587_s18 + $0x8] sm:$0xff]   ;;  %v1250_v43 = vpack.c.bf16 %v4730_v38, %v4728_v37 }
 0x13c   : > { %1216 = vmatpush1.bf16.msra.mxu0 %v3686_v41  ;;  %v814_v41 = vld [vmem:[#allocation15 + $0x10] sm:$0xff] }
 0x13d   : > { %1217 = vmatprep.subr.bf16.mxu0 %v3694_v44  ;;  %v1252_v44 = vpack.c.bf16 %v4740_v42, %v814_v41 }
 0x140   : > { %1218 = vmatpush1.bf16.msra.mxu0 %v3692_v45  ;;  %v3704_v45 = vld [vmem:[%s4608_s1 + $0x4] ss:$16 sps:$4 sm:$0xff]  }
 0x1f6   : > { %v924_v49 = vpop.f32.mrb[0].mxu0 }
 0x1f7   : > { %v925_v50 = vadd.f32 %v3245_v48, %v924_v49  ;;  %v3491_v51 = vpop.f32.mrb[1].mxu0  ;;  %v3699_v49 = vld [vmem:[%s5587_s18 + $0x18] sm:$0xff]  }
 0x1f8   : > { %v927_v52 = vpop.f32.mrb[2].mxu0  ;;  %v4780_v51 = vld [vmem:[%s5587_s18 + $0x28] sm:$0xff]  }
 0x1f9   : > { %v3254_v53 = vmul.f32 -1.442695, %v925_v50  ;;  %v928_v54 = vadd.f32 %v3245_v48, %v927_v52  ;;  %v3492_v55 = vpop.f32.mrb[3].mxu0  ;;  %v3710_v48 = vld [vmem:[%s4608_s1 + $0xc] ss:$16 sps:$4 sm:$0xff]  }
 0x1fa   : > { %v3702_v52 = vld [vmem:[%s4608_s1] ss:$16 sps:$4 sm:$0xff]   ;;  %v3713_v55 = vld [vmem:[%s4608_s1 + $0x44] ss:$16 sps:$4 sm:$0xff]  }
 0x1fb   : > { %3826 = vpow2.f32 %v3254_v53  ;;  %v3255_v56 = vmul.f32 -1.442695, %v928_v54  ;;  %v3707_v53 = vld [vmem:[%s4608_s1 + $0x24] ss:$16 sps:$4 sm:$0xff]  }
 0x1fd   : > { %3828 = vpow2.f32 %v3255_v56  ;;  %v3711_v56 = vld [vmem:[%s4608_s1 + $0x40] ss:$16 sps:$4 sm:$0xff]  }
 0x205   : > { %v3827_v57 = vpop.eup %3826 }
 0x206   : > { %v937_v58 = vadd.f32 1.0, %v3827_v57  ;;  %v3719_v57 = vld [vmem:[%s4608_s1 + $0x64] ss:$16 sps:$4 sm:$0xff]  }
 0x207   : > { %v3829_v59 = vpop.eup %3828 }
 0x208   : > { %3830 = vrcp.f32 %v937_v58  ;;  %v938_v60 = vadd.f32 1.0, %v3829_v59  ;;  %v3717_v58 = vld [vmem:[%s4608_s1 + $0x60] ss:$16 sps:$4 sm:$0xff]   ;;  %v3728_v59 = vld [vmem:[%s4608_s1 + $0x84] ss:$16 sps:$4 sm:$0xff]  }
 0x20a   : > { %3832 = vrcp.f32 %v938_v60  ;;  %v3708_v60 = vld [vmem:[%s4608_s1 + $0x8] ss:$16 sps:$4 sm:$0xff]  }
 0x212   : > { %v3831_v61 = vpop.eup %3830 }
 0x213   : > { %v943_v63 = vmul.f32 %v3831_v61, %v925_v50  ;;  %v4770_v50 = vld [vmem:[%s5587_s18 + $0x20] sm:$0xff]   ;;  %v3716_v61 = vld [vmem:[%s4608_s1 + $0x2c] ss:$16 sps:$4 sm:$0xff]  }
 0x214   : > { %v3833_v62 = vpop.eup %3832 }
 0x215   : > { %v944_v0 = vmul.f32 %v3833_v62, %v928_v54  ;;  %v3705_v54 = vld [vmem:[%s4608_s1 + $0x20] ss:$16 sps:$4 sm:$0xff]  }
 0x216   : > { %v3726_v62 = vld [vmem:[%s4608_s1 + $0x80] ss:$16 sps:$4 sm:$0xff]  }
 0x217   : > { %v945_v1 = vpack.c.bf16 %v944_v0, %v943_v63  ;;  %v3734_v63 = vld [vmem:[%s4608_s1 + $0xa4] ss:$16 sps:$4 sm:$0xff]   ;;  %v3714_v0 = vld [vmem:[%s4608_s1 + $0x28] ss:$16 sps:$4 sm:$0xff]  }
 0x219   : > { %1193 = vmatmul.mubr.bf16.vlgmr.msra.gmra.mrb[0].mxu1 %v945_v1  ;;  %1236 = vmatmul.mubr.bf16.vlgmr.msra.gmra.mrb[4].mxu0 %v945_v1  ;;  %v3722_v1 = vld [vmem:[%s4608_s1 + $0x4c] ss:$16 sps:$4 sm:$0xff]  }
 0x21a   : > { %1346 = vmatprep.mubr.bf16.mxu0 %v5512_v47  ;;  %1356 = vmatprep.mubr.bf16.mxu1 %v5512_v47 }
 0x2ec   : > { %v1194_v12 = vpop.f32.mrb[0].mxu1  ;;  %v1237_v13 = vpop.f32.mrb[4].mxu0 }
 0x2ed   : > { %v1196_v16 = vpop.f32.mrb[1].mxu1  ;;  %v1239_v17 = vpop.f32.mrb[5].mxu0  ;;  %v1195_v20 = vadd.f32 %v1194_v12, %v983_v10  ;;  %v1238_v21 = vadd.f32 %v1237_v13, %v991_v11  ;;  %v3723_v12 = vld [vmem:[%s4608_s1 + $0x68] ss:$16 sps:$4 sm:$0xff]   ;;  %v3749_v13 = vld [vmem:[%s4608_s1 + $0xe4] ss:$16 sps:$4 sm:$0xff]  }
 0x2ee   : > { %v1198_v18 = vpop.f32.mrb[2].mxu1  ;;  %v1241_v19 = vpop.f32.mrb[6].mxu0  ;;  %v1197_v28 = vadd.f32 %v1196_v16, %v987_v14  ;;  %v1240_v29 = vadd.f32 %v1239_v17, %v995_v15  ;;  %v3737_v16 = vld [vmem:[%s4608_s1 + $0xac] ss:$16 sps:$4 sm:$0xff]   ;;  %v3747_v17 = vld [vmem:[%s4608_s1 + $0xe0] ss:$16 sps:$4 sm:$0xff]  }
 0x2ef   : > { %v1199_v22 = vadd.f32 %v1198_v18, %v983_v10  ;;  %v1242_v23 = vadd.f32 %v1241_v19, %v991_v11  ;;  %v1200_v24 = vpop.f32.mrb[3].mxu1  ;;  %v1243_v25 = vpop.f32.mrb[7].mxu0  ;;  %v3743_v10 = vld [vmem:[%s4608_s1 + $0xc4] ss:$16 sps:$4 sm:$0xff]   ;;  %v3741_v11 = vld [vmem:[%s4608_s1 + $0xc0] ss:$16 sps:$4 sm:$0xff]  }
 0x2f0   : > { %v1201_v30 = vadd.f32 %v1200_v24, %v987_v14  ;;  %v1244_v31 = vadd.f32 %v1243_v25, %v995_v15  ;;  %v3731_v14 = vld [vmem:[%s4608_s1 + $0x8c] ss:$16 sps:$4 sm:$0xff]   ;;  %v3729_v15 = vld [vmem:[%s4608_s1 + $0x88] ss:$16 sps:$4 sm:$0xff]   ;;  %v3752_v25 = vld [vmem:[%s5589_s29 + $0x10] sm:$0xff]  }
 0x2f1   : > { %v1246_v32 = vpack.c.bf16 %v1199_v22, %v1195_v20  ;;  %v1248_v33 = vpack.c.bf16 %v1242_v23, %v1238_v21  ;;  %v3735_v18 = vld [vmem:[%s4608_s1 + $0xa8] ss:$16 sps:$4 sm:$0xff]   ;;  %v3740_v19 = vld [vmem:[%s4608_s1 + $0xcc] ss:$16 sps:$4 sm:$0xff]   ;;  %v3750_v23 = vld [vmem:[%s5589_s29] sm:$0xff]  }
 0x2f2   : > { %v1247_v34 = vpack.c.bf16 %v1201_v30, %v1197_v28  ;;  %v1249_v35 = vpack.c.bf16 %v1244_v31, %v1240_v29  ;;  %v3738_v20 = vld [vmem:[%s4608_s1 + $0xc8] ss:$16 sps:$4 sm:$0xff]   ;;  %v3746_v21 = vld [vmem:[%s4608_s1 + $0xec] ss:$16 sps:$4 sm:$0xff]  }
 0x2f3   : > { %v3744_v22 = vld [vmem:[%s4608_s1 + $0xe8] ss:$16 sps:$4 sm:$0xff]  }
 0x2f4   : > { %1314 = vmatprep.subr.bf16.mxu0 %v1247_v34  ;;  %3527 = vmatprep.subr.bf16.mxu1 %v1247_v34  ;;  %v3751_v24 = vld [vmem:[%s5589_s29 + $0x8] sm:$0xff]  }
 0x2f5   : > { %1315 = vmatpush1.bf16.msra.mxu0 %v1246_v32  ;;  %3528 = vmatpush1.bf16.msra.mxu1 %v1246_v32 }
 0x2f6   : > { %1395 = vmatprep.subr.bf16.mxu0 %v1249_v35  ;;  %1476 = vmatprep.subr.bf16.mxu1 %v1251_v36 }
 0x2f8   : > { %3294 = vmatmul.mubr.msk.bf16.vlgmr.msra.gmra.mrb[8].mxu0 %vm1295_vm1, %v3696_v39  ;;  %3295 = vmatmul.mubr.msk.bf16.vlgmr.msra.gmra.mrb[4].mxu1 %vm1295_vm1, %v4738_v40 }
 0x2f9   : > { %1396 = vmatpush1.bf16.msra.mxu0 %v1248_v33  ;;  %1477 = vmatpush1.bf16.msra.mxu1 %v1250_v43 }
 0x2fa   : > { %1366 = vmatprep.mubr.bf16.mxu1 %v5512_v47  ;;  %1427 = vmatprep.mubr.bf16.mxu0 %v5512_v47 }
 0x2fb   : > { %3493 = vmatprep.subr.bf16.mxu0 %v1252_v44  ;;  %1866 = vmatprep.subr.bf16.mxu1 %v3704_v45  ;;  %v3754_v45 = vld [vmem:[%s4614_s24] ss:$8 sps:$4 sm:$0xff]  }
 0x300   : > { %3296 = vmatmul.mubr.msk.bf16.gmra.mrb[8].mxu1 %vm1295_vm1, %v3698_v46  ;;  %3300 = vmatmul.mubr.msk.bf16.vlgmr.msra.gmra.mrb[12].mxu0 %vm1295_vm1, %v3696_v39 }
 0x301   : > { %3494 = vmatpush3.bf16.msra.mxu0 %v1252_v44  ;;  %1376 = vmatprep.mubr.bf16.mxu1 %v5512_v47 }
 0x302   : > { %1437 = vmatprep.mubr.bf16.mxu0 %v5512_v47  ;;  %1929 = vmatprep.subr.bf16.mxu0 %v3710_v48  ;;  %v3759_v48 = vld [vmem:[%s4614_s24 + $0x14] ss:$8 sps:$4 sm:$0xff]  }
 0x308   : > { %3297 = vmatmul.mubr.msk.bf16.gmra.mrb[12].mxu1 %vm1295_vm1, %v3699_v49  ;;  %3301 = vmatmul.mubr.msk.bf16.gmra.mrb[16].mxu0 %vm1295_vm1, %v4738_v40 }
 0x309   : > { %1382 = vmatprep.mubr.bf16.mxu1 %v5512_v47  ;;  %1447 = vmatprep.mubr.bf16.mxu0 %v5512_v47 }
 0x310   : > { %3298 = vmatmul.mubr.msk.bf16.gmra.mrb[16].mxu1 %vm1295_vm1, %v4770_v50  ;;  %3302 = vmatmul.mubr.msk.bf16.gmra.mrb[20].mxu0 %vm1295_vm1, %v3698_v46 }
 0x311   : > { %1388 = vmatprep.mubr.bf16.mxu1 %v5512_v47  ;;  %1457 = vmatprep.mubr.bf16.mxu0 %v5512_v47 }
 0x318   : > { %3299 = vmatmul.mubr.msk.bf16.gmra.mrb[20].mxu1 %vm1295_vm1, %v4780_v51  ;;  %3303 = vmatmul.mubr.msk.bf16.gmra.mrb[24].mxu0 %vm1295_vm1, %v3699_v49 }
 0x319   : > { %1463 = vmatprep.mubr.bf16.mxu0 %v5512_v47  ;;  %1508 = vmatprep.mubr.bf16.mxu1 %v5512_v47 }
 0x320   : > { %3304 = vmatmul.mubr.msk.bf16.gmra.mrb[28].mxu0 %vm1295_vm1, %v4770_v50  ;;  %3306 = vmatmul.mubr.msk.bf16.vlgmr.msra.gmra.mrb[24].mxu1 %vm1295_vm1, %v3696_v39 }
 0x321   : > { %1867 = vmatpush1.bf16.msra.mxu1 %v3702_v52  ;;  %1469 = vmatprep.mubr.bf16.mxu0 %v5512_v47  ;;  %v3762_v52 = vld [vmem:[%s4614_s24 + $0x24] ss:$8 sps:$4 sm:$0xff]  }
 0x322   : > { %1518 = vmatprep.mubr.bf16.mxu1 %v5512_v47  ;;  %1868 = vmatprep.subr.bf16.mxu1 %v3707_v53 }
 0x325   : > { %1869 = vmatpush1.bf16.msra.mxu1 %v3705_v54 }
 0x326   : > { %1870 = vmatprep.subr.bf16.mxu1 %v3713_v55 }
 0x328   : > { %3305 = vmatmul.mubr.msk.bf16.gmra.mrb[32].mxu0 %vm1295_vm1, %v4780_v51  ;;  %3307 = vmatmul.mubr.msk.bf16.gmra.mrb[28].mxu1 %vm1295_vm1, %v4738_v40 }
 0x329   : > { %1528 = vmatprep.mubr.bf16.mxu1 %v5512_v47  ;;  %3495 = vmatprep.mubr.msk.bf16.mxu0 %vm1295_vm1, %v3696_v39 }
 0x32a   : > { %1871 = vmatpush1.bf16.msra.mxu1 %v3711_v56 }
 0x32b   : > { %1872 = vmatprep.subr.bf16.mxu1 %v3719_v57 }
 0x32e   : > { %1873 = vmatpush1.bf16.msra.mxu1 %v3717_v58 }
 0x32f   : > { %1874 = vmatprep.subr.bf16.mxu1 %v3728_v59  ;;  %v3760_v59 = vld [vmem:[%s4614_s24 + $0x20] ss:$8 sps:$4 sm:$0xff]  }
 0x330   : > { %3308 = vmatmul.mubr.msk.bf16.gmra.mrb[32].mxu1 %vm1295_vm1, %v3698_v46  ;;  %3496 = vmatmul.mubr.msk.bf16.vlgmr.msra.gmra.mrb[36].mxu0 %vm1295_vm1, %v4738_v40 }
 0x331   : > { %1930 = vmatpush1.bf16.msra.mxu0 %v3708_v60  ;;  %1538 = vmatprep.mubr.bf16.mxu1 %v5512_v47  ;;  %v3765_v60 = vld [vmem:[%s4614_s24 + $0x34] ss:$8 sps:$4 sm:$0xff]  }
 0x332   : > { %1931 = vmatprep.subr.bf16.mxu0 %v3716_v61  ;;  %3499 = vmatprep.mubr.msk.bf16.mxu0 %vm1295_vm1, %v3698_v46  ;;  %v3756_v46 = vld [vmem:[%s4614_s24 + $0x4] ss:$8 sps:$4 sm:$0xff]   ;;  %v3763_v61 = vld [vmem:[%s4614_s24 + $0x30] ss:$8 sps:$4 sm:$0xff]  }
 0x333   : > { %1875 = vmatpush1.bf16.msra.mxu1 %v3726_v62 }
 0x334   : > { %1876 = vmatprep.subr.bf16.mxu1 %v3734_v63 }
 0x335   : > { %1932 = vmatpush1.bf16.msra.mxu0 %v3714_v0  ;;  %v3768_v0 = vld [vmem:[%s4614_s24 + $0x44] ss:$8 sps:$4 sm:$0xff]  }
 0x336   : > { %1933 = vmatprep.subr.bf16.mxu0 %v3722_v1 }
 0x337   : > { %1877 = vmatpush1.bf16.msra.mxu1 %v3732_v2 }
 0x338   : > { %3309 = vmatmul.mubr.msk.bf16.gmra.mrb[36].mxu1 %vm1295_vm1, %v3699_v49  ;;  %3500 = vmatmul.mubr.msk.bf16.gmra.mrb[40].mxu0 %vm1295_vm1, %v3699_v49  ;;  %v3757_v49 = vld [vmem:[%s4614_s24 + $0x10] ss:$8 sps:$4 sm:$0xff]  }
 0x339   : > { %1934 = vmatpush1.bf16.msra.mxu0 %v3720_v7  ;;  %1548 = vmatprep.mubr.bf16.mxu1 %v5512_v47 }
 0x33a   : > { %1935 = vmatprep.subr.bf16.mxu0 %v3725_v9  ;;  %3503 = vmatprep.mubr.msk.bf16.mxu0 %vm1295_vm1, %v4770_v50 }
 0x33b   : > { %1878 = vmatprep.subr.bf16.mxu1 %v3743_v10 }
 0x33c   : > { %1879 = vmatpush1.bf16.msra.mxu1 %v3741_v11 }
 0x33d   : > { %1936 = vmatpush1.bf16.msra.mxu0 %v3723_v12  ;;  %1880 = vmatprep.subr.bf16.mxu1 %v3749_v13  ;;  %v3766_v12 = vld [vmem:[%s4614_s24 + $0x40] ss:$8 sps:$4 sm:$0xff]   ;;  %v3771_v13 = vld [vmem:[%s4614_s24 + $0x54] ss:$8 sps:$4 sm:$0xff]  }
 0x33e   : > { %1937 = vmatprep.subr.bf16.mxu0 %v3731_v14  ;;  %v3769_v14 = vld [vmem:[%s4614_s24 + $0x50] ss:$8 sps:$4 sm:$0xff]  }
 0x340   : > { %3310 = vmatmul.mubr.msk.bf16.gmra.mrb[40].mxu1 %vm1295_vm1, %v4770_v50  ;;  %3504 = vmatmul.mubr.msk.bf16.gmra.mrb[44].mxu0 %vm1295_vm1, %v4780_v51 }
 0x341   : > { %1938 = vmatpush1.bf16.msra.mxu0 %v3729_v15  ;;  %1558 = vmatprep.mubr.bf16.mxu1 %v5512_v47 }
 0x342   : > { %1939 = vmatprep.subr.bf16.mxu0 %v3737_v16  ;;  %1881 = vmatpush1.bf16.msra.mxu1 %v3747_v17 }
 0x343   : > { %1961 = vmatprep.mubr.bf16.mxu0 %v5512_v47 }
 0x345   : > { %1940 = vmatpush1.bf16.msra.mxu0 %v3735_v18 }
 0x346   : > { %1941 = vmatprep.subr.bf16.mxu0 %v3740_v19 }
 0x348   : > { %3311 = vmatmul.mubr.msk.bf16.gmra.mrb[44].mxu1 %vm1295_vm1, %v4780_v51 }
 0x349   : > { %1942 = vmatpush1.bf16.msra.mxu0 %v3738_v20  ;;  %1898 = vmatprep.mubr.bf16.mxu1 %v5512_v47 }
 0x34a   : > { %1943 = vmatprep.subr.bf16.mxu0 %v3746_v21 }
 0x34d   : > { %1944 = vmatpush1.bf16.msra.mxu0 %v3744_v22 }
 0x34e   : > { %2394 = vmatprep.subr.bf16.mxu0 %v3756_v46 }
 0x350   : > { %1962 = vmatmul.mubr.bf16.vlgmr.msra.gmra.mrb[48].mxu0 %v3750_v23  ;;  %1899 = vmatmul.mubr.bf16.vlgmr.msra.gmra.mrb[48].mxu1 %v3750_v23 }
 0x351   : > { %1971 = vmatprep.mubr.bf16.mxu0 %v5512_v47  ;;  %1908 = vmatprep.mubr.bf16.mxu1 %v5512_v47 }
 0x352   : > { %2395 = vmatpush1.bf16.msra.mxu0 %v3754_v45 }
 0x353   : > { %2396 = vmatprep.subr.bf16.mxu0 %v3759_v48 }
 0x356   : > { %2397 = vmatpush1.bf16.msra.mxu0 %v3757_v49 }
 0x357   : > { %2398 = vmatprep.subr.bf16.mxu0 %v3762_v52 }
 0x358   : > { %1972 = vmatmul.mubr.bf16.gmra.mrb[52].mxu0 %v3751_v24  ;;  %1909 = vmatmul.mubr.bf16.gmra.mrb[52].mxu1 %v3751_v24 }
 0x359   : > { %1981 = vmatprep.mubr.bf16.mxu0 %v5512_v47  ;;  %1918 = vmatprep.mubr.bf16.mxu1 %v5512_v47 }
 0x35a   : > { %2399 = vmatpush1.bf16.msra.mxu0 %v3760_v59 }
 0x35b   : > { %2400 = vmatprep.subr.bf16.mxu0 %v3765_v60 }
 0x35e   : > { %2401 = vmatpush1.bf16.msra.mxu0 %v3763_v61 }
 0x35f   : > { %2402 = vmatprep.subr.bf16.mxu0 %v3768_v0 }
 0x360   : > { %1982 = vmatmul.mubr.bf16.gmra.mrb[56].mxu0 %v3752_v25  ;;  %1919 = vmatmul.mubr.bf16.gmra.mrb[56].mxu1 %v3752_v25 }
 0x361   : > { %2233 = vmatprep.mubr.bf16.mxu1 %v5512_v47  ;;  %2426 = vmatprep.mubr.bf16.mxu0 %v5512_v47 }
 0x362   : > { %2403 = vmatpush1.bf16.msra.mxu0 %v3766_v12 }
 0x363   : > { %2404 = vmatprep.subr.bf16.mxu0 %v3771_v13 }
 0x366   : > { %2405 = vmatpush1.bf16.msra.mxu0 %v3769_v14 }
 0x3cb   : > { %v4862_v26 = vpop.f32.mrb[8].mxu0  ;;  %v4864_v27 = vpop.f32.mrb[4].mxu1 }
 0x3cc   : > { %v4866_v28 = vpop.f32.mrb[9].mxu0  ;;  %v4868_v29 = vpop.f32.mrb[5].mxu1 }
 0x3cd   : > { %v4870_v30 = vpop.f32.mrb[10].mxu0  ;;  %v4872_v31 = vpop.f32.mrb[6].mxu1 }
 0x3ce   : > { %v4874_v32 = vpop.f32.mrb[11].mxu0  ;;  %v4876_v33 = vpop.f32.mrb[7].mxu1 }
 0x3cf   : > { %5590 = vst [vmem:[#allocation30_spill] sm:$0xff] %v4876_v33 }
 0x3d3   : > { %v4878_v34 = vpop.f32.mrb[8].mxu1  ;;  %v4880_v35 = vpop.f32.mrb[12].mxu0 }
 0x3d4   : > { %5591 = vst [vmem:[#allocation31_spill] sm:$0xff] %v4878_v34  ;;  %v4882_v36 = vpop.f32.mrb[9].mxu1  ;;  %v4884_v39 = vpop.f32.mrb[13].mxu0 }
 0x3d5   : > { %5592 = vst [vmem:[#allocation32_spill] sm:$0xff] %v4882_v36  ;;  %v4886_v40 = vpop.f32.mrb[10].mxu1  ;;  %v4888_v41 = vpop.f32.mrb[14].mxu0 }
 0x3d6   : > { %5593 = vst [vmem:[#allocation33_spill] sm:$0xff] %v4886_v40  ;;  %v4890_v43 = vpop.f32.mrb[11].mxu1  ;;  %v4892_v44 = vpop.f32.mrb[15].mxu0 }
 0x3d7   : > { %5594 = vst [vmem:[#allocation34_spill] sm:$0xff] %v4890_v43 }
 0x3db   : > { %v1378_v50 = vpop.f32.mrb[12].mxu1  ;;  %v4898_v51 = vpop.f32.mrb[16].mxu0 }
 0x3dc   : > { %v1379_v53 = vpop.f32.mrb[13].mxu1  ;;  %v4901_v54 = vpop.f32.mrb[17].mxu0 }
 0x3dd   : > { %v1380_v55 = vpop.f32.mrb[14].mxu1  ;;  %v4903_v56 = vpop.f32.mrb[18].mxu0 }
 0x3de   : > { %v1381_v57 = vpop.f32.mrb[15].mxu1  ;;  %v4905_v58 = vpop.f32.mrb[19].mxu0 }
 0x3df   : > { %5595 = vst [vmem:[#allocation35_spill] sm:$0xff] %v4905_v58 }
 0x3e3   : > { %v1384_v62 = vpop.f32.mrb[16].mxu1  ;;  %v4910_v63 = vpop.f32.mrb[20].mxu0 }
 0x3e4   : > { %5596 = vst [vmem:[#allocation36_spill] sm:$0xff] %v4910_v63  ;;  %v1385_v1 = vpop.f32.mrb[17].mxu1  ;;  %v4913_v2 = vpop.f32.mrb[21].mxu0 }
 0x3e5   : > { %5597 = vst [vmem:[#allocation37_spill] sm:$0xff] %v4913_v2  ;;  %v1386_v7 = vpop.f32.mrb[18].mxu1  ;;  %v4915_v9 = vpop.f32.mrb[22].mxu0 }
 0x3e6   : > { %5598 = vst [vmem:[#allocation38_spill] sm:$0xff] %v4915_v9  ;;  %v1387_v10 = vpop.f32.mrb[19].mxu1  ;;  %v4917_v11 = vpop.f32.mrb[23].mxu0 }
 0x3e7   : > { %5599 = vst [vmem:[#allocation39_spill] sm:$0xff] %v4917_v11 }
 0x3eb   : > { %v1390_v15 = vpop.f32.mrb[20].mxu1  ;;  %v1459_v16 = vpop.f32.mrb[24].mxu0 }
 0x3ec   : > { %v1391_v17 = vpop.f32.mrb[21].mxu1  ;;  %v1460_v18 = vpop.f32.mrb[25].mxu0 }
 0x3ed   : > { %v1392_v19 = vpop.f32.mrb[22].mxu1  ;;  %v1461_v20 = vpop.f32.mrb[26].mxu0 }
 0x3ee   : > { %v1393_v21 = vpop.f32.mrb[23].mxu1  ;;  %v1462_v22 = vpop.f32.mrb[27].mxu0 }
 0x3f3   : > { %v1465_v23 = vpop.f32.mrb[28].mxu0  ;;  %v4922_v24 = vpop.f32.mrb[24].mxu1 }
 0x3f4   : > { %v1466_v25 = vpop.f32.mrb[29].mxu0  ;;  %v4924_v45 = vpop.f32.mrb[25].mxu1 }
 0x3f5   : > { %v1467_v46 = vpop.f32.mrb[30].mxu0  ;;  %v4926_v48 = vpop.f32.mrb[26].mxu1 }
 0x3f6   : > { %v1468_v49 = vpop.f32.mrb[31].mxu0  ;;  %v4928_v50 = vpop.f32.mrb[27].mxu1 }
 0x3fb   : > { %v1471_v52 = vpop.f32.mrb[32].mxu0  ;;  %v4930_v53 = vpop.f32.mrb[28].mxu1 }
 0x3fc   : > { %v1472_v55 = vpop.f32.mrb[33].mxu0  ;;  %v4932_v57 = vpop.f32.mrb[29].mxu1 }
 0x3fd   : > { %v1473_v59 = vpop.f32.mrb[34].mxu0  ;;  %v4934_v60 = vpop.f32.mrb[30].mxu1 }
 0x3fe   : > { %5600 = vst [vmem:[#allocation40_spill] sm:$0xff] %v4934_v60  ;;  %v1474_v61 = vpop.f32.mrb[35].mxu0  ;;  %v4936_v62 = vpop.f32.mrb[31].mxu1 }
 0x3ff   : > { %5601 = vst [vmem:[#allocation41_spill] sm:$0xff] %v4936_v62 }
 0x403   : > { %v4938_v0 = vpop.f32.mrb[32].mxu1  ;;  %v4940_v1 = vpop.f32.mrb[36].mxu0 }
 0x404   : > { %5602 = vst [vmem:[#allocation42_spill] sm:$0xff] %v4940_v1  ;;  %v4942_v7 = vpop.f32.mrb[33].mxu1  ;;  %v4944_v10 = vpop.f32.mrb[37].mxu0 }
 0x405   : > { %5603 = vst [vmem:[#allocation43_spill] sm:$0xff] %v4942_v7  ;;  %v4946_v12 = vpop.f32.mrb[34].mxu1  ;;  %v4948_v13 = vpop.f32.mrb[38].mxu0 }
 0x406   : > { %5604 = vst [vmem:[#allocation44_spill] sm:$0xff] %v4946_v12  ;;  %5605 = vst [vmem:[#allocation45_spill] sm:$0xff] %v4948_v13  ;;  %v4950_v14 = vpop.f32.mrb[35].mxu1  ;;  %v4952_v15 = vpop.f32.mrb[39].mxu0 }
 0x407   : > { %5606 = vst [vmem:[#allocation46_spill] sm:$0xff] %v4950_v14 }
 0x40b   : > { %v1540_v16 = vpop.f32.mrb[36].mxu1  ;;  %v3501_v17 = vpop.f32.mrb[40].mxu0 }
 0x40c   : > { %v4955_v18 = vmul.f32 %v4944_v10, %v1540_v16  ;;  %v4958_v19 = vmul.f32 %v1540_v16, %v4924_v45  ;;  %v4961_v20 = vmul.f32 %v3501_v17, %v4924_v45  ;;  %v4964_v21 = vmul.f32 %v3501_v17, %v4922_v24  ;;  %v1542_v22 = vpop.f32.mrb[37].mxu1  ;;  %v4966_v23 = vpop.f32.mrb[41].mxu0 }
 0x40d   : > { %5607 = vst [vmem:[#allocation47_spill] sm:$0xff] %v4966_v23  ;;  %v4969_v25 = vmul.f32 %v4944_v10, %v1542_v22  ;;  %v4972_v46 = vmul.f32 %v1542_v22, %v4922_v24  ;;  %v1544_v49 = vpop.f32.mrb[38].mxu1  ;;  %v3502_v52 = vpop.f32.mrb[42].mxu0 }
 0x40e   : > { %v4977_v59 = vmul.f32 %v4952_v15, %v1544_v49  ;;  %v4980_v61 = vmul.f32 %v1544_v49, %v4928_v50  ;;  %v4983_v16 = vmul.f32 %v3502_v52, %v4928_v50  ;;  %v1546_v17 = vpop.f32.mrb[39].mxu1  ;;  %v4985_v6 = vpop.f32.mrb[43].mxu0  ;;  %v4992_v5 = vmul.f32 %v3502_v52, %v4926_v48 }
 0x40f   : > { %5608 = vst [vmem:[#allocation48_spill] sm:$0xff] %v4985_v6  ;;  %v4995_v4 = vmul.f32 %v4952_v15, %v1546_v17  ;;  %v4998_v49 = vmul.f32 %v1546_v17, %v4926_v48 }
 0x413   : > { %v1550_v3 = vpop.f32.mrb[40].mxu1  ;;  %v3505_v8 = vpop.f32.mrb[44].mxu0 }
 0x414   : > { %v5007_v52 = vmul.f32 %v4940_v1, %v1550_v3  ;;  %v5010_v42 = vmul.f32 %v1550_v3, %v4932_v57  ;;  %v5013_v17 = vmul.f32 %v3505_v8, %v4942_v7  ;;  %v5016_v38 = vmul.f32 %v3505_v8, %v4938_v0  ;;  %v1552_v47 = vpop.f32.mrb[41].mxu1  ;;  %v1635_v37 = vpop.f32.mrb[45].mxu0 }
 0x415   : > { %v5019_v55 = vmul.f32 %v4940_v1, %v1552_v47  ;;  %v5022_v22 = vmul.f32 %v1552_v47, %v4930_v53  ;;  %v5025_v43 = vmul.f32 %v1635_v37, %v4932_v57  ;;  %v5028_v3 = vmul.f32 %v1635_v37, %v4930_v53  ;;  %v1554_v11 = vpop.f32.mrb[42].mxu1  ;;  %v3506_v40 = vpop.f32.mrb[46].mxu0 }
 0x416   : > { %5609 = vst [vmem:[#allocation49_spill] sm:$0xff] %v5013_v17  ;;  %5610 = vst [vmem:[#allocation50_spill] sm:$0xff] %v5016_v38  ;;  %v5031_v9 = vmul.f32 %v4948_v13, %v1554_v11  ;;  %v5034_v8 = vmul.f32 %v1554_v11, %v4936_v62  ;;  %v5037_v36 = vmul.f32 %v3506_v40, %v4950_v14  ;;  %v1556_v2 = vpop.f32.mrb[43].mxu1  ;;  %v1638_v34 = vpop.f32.mrb[47].mxu0  ;;  %v2071_v38 = vld [vmem:[#allocation2 + $0x8] sm:$0xff]  ;;  %v2072_v17 = vld [vmem:[#allocation2 + $0x10] sm:$0xff] }
 0x417   : > { %5611 = vst [vmem:[#allocation51_spill] sm:$0xff] %v5022_v22  ;;  %v5040_v47 = vmul.f32 %v3506_v40, %v4946_v12  ;;  %v5049_v11 = vmul.f32 %v4948_v13, %v1556_v2  ;;  %v5052_v58 = vmul.f32 %v1556_v2, %v4934_v60  ;;  %v5055_v40 = vmul.f32 %v1638_v34, %v4936_v62 }
 0x418   : > { %5612 = vst [vmem:[#allocation52_spill] sm:$0xff] %v5034_v8  ;;  %5613 = vst [vmem:[#allocation53_spill] sm:$0xff] %v5037_v36  ;;  %v5058_v1 = vmul.f32 %v1638_v34, %v4934_v60 }
 0x419   : > { %5614 = vst [vmem:[#allocation54_spill] sm:$0xff] %v5040_v47  ;;  %5615 = vst [vmem:[#allocation55_spill] sm:$0xff] %v5052_v58 }
 0x41b   : > { %v1560_v13 = vpop.f32.mrb[44].mxu1 }
 0x41c   : > { %v5067_v22 = vmul.f32 %v4966_v23, %v1560_v13  ;;  %v5070_v2 = vmul.f32 %v1560_v13, %v4942_v7  ;;  %v1562_v62 = vpop.f32.mrb[45].mxu1  ;;  %v2070_v13 = vld [vmem:[#allocation2] sm:$0xff] }
 0x41d   : > { %v5073_v34 = vmul.f32 %v4966_v23, %v1562_v62  ;;  %v5076_v60 = vmul.f32 %v1562_v62, %v4938_v0  ;;  %v1564_v37 = vpop.f32.mrb[46].mxu1 }
 0x41e   : > { %5616 = vst [vmem:[#allocation56_spill] sm:$0xff] %v5067_v22  ;;  %5617 = vst [vmem:[#allocation57_spill] sm:$0xff] %v5070_v2  ;;  %v5081_v33 = vmul.f32 %v4985_v6, %v1564_v37  ;;  %v5084_v58 = vmul.f32 %v1564_v37, %v4950_v14  ;;  %v1566_v8 = vpop.f32.mrb[47].mxu1 }
 0x41f   : > { %5618 = vst [vmem:[#allocation58_spill] sm:$0xff] %v5076_v60  ;;  %v5091_v62 = vmul.f32 %v4985_v6, %v1566_v8  ;;  %v5094_v7 = vmul.f32 %v1566_v8, %v4946_v12 }
 0x420   : > { %5619 = vst [vmem:[#allocation59_spill] sm:$0xff] %v5081_v33  ;;  %5620 = vst [vmem:[#allocation60_spill] sm:$0xff] %v5084_v58 }
 0x421   : > { %5621 = vst [vmem:[#allocation61_spill] sm:$0xff] %v5091_v62  ;;  %5622 = vst [vmem:[#allocation62_spill] sm:$0xff] %v5094_v7 }
 0x423   : > { %v1963_v22 = vpop.f32.mrb[48].mxu0  ;;  %v1900_v23 = vpop.f32.mrb[48].mxu1 }
 0x424   : > { %v1994_v6 = vmul.f32 %v1963_v22, %v4880_v35  ;;  %v1992_v60 = vmul.f32 %v1900_v23, %v4862_v26  ;;  %v1965_v8 = vpop.f32.mrb[49].mxu0  ;;  %v1902_v12 = vpop.f32.mrb[49].mxu1  ;;  %v5623_v23 = vsub.f32 %v4969_v25, %v4961_v20  ;;  %v2073_v22 = vld [vmem:[#allocation2 + $0x18] sm:$0xff] }
 0x425   : > { %v1995_v2 = vmul.f32 %v1965_v8, %v4884_v39  ;;  %v5106_v63 = vmul.f32 %v1902_v12, %v4866_v28  ;;  %v1967_v37 = vpop.f32.mrb[50].mxu0  ;;  %v1904_v33 = vpop.f32.mrb[50].mxu1  ;;  %v5624_v28 = vsub.f32 %v4964_v21, %v4955_v18 }
 0x426   : > { %v2088_v47 = vmul.f32 %v2070_v13, %v1994_v6  ;;  %v2118_v14 = vmul.f32 %v2071_v38, %v1994_v6  ;;  %v2148_v7 = vmul.f32 %v2072_v17, %v1994_v6  ;;  %v2094_v58 = vmul.f32 %v1992_v60, %v4922_v24  ;;  %v1969_v36 = vpop.f32.mrb[51].mxu0  ;;  %v1906_v62 = vpop.f32.mrb[51].mxu1  ;;  %v2074_v38 = vld [vmem:[#allocation2 + $0x20] sm:$0xff]  ;;  %v2075_v6 = vld [vmem:[#allocation2 + $0x28] sm:$0xff] }
 0x427   : > { %v2124_v35 = vmul.f32 %v1992_v60, %v4924_v45  ;;  %v2154_v26 = vmul.f32 %v1992_v60, %v4944_v10  ;;  %v5114_v39 = vmul.f32 %v5623_v23, %v1995_v2  ;;  %v2136_v12 = vmul.f32 %v5624_v28, %v1995_v2 }
 0x428   : > { %v5119_v17 = vadd.f32 %v2094_v58, %v2088_v47  ;;  %v5625_v24 = vsub.f32 %v4958_v19, %v4972_v46  ;;  %v1998_v60 = vmul.f32 %v1967_v37, %v4888_v41  ;;  %v1996_v10 = vmul.f32 %v1904_v33, %v4870_v30  ;;  %v2078_v37 = vld [vmem:[#allocation2 + $0x40] sm:$0xff] }
 0x429   : > { %v2130_v20 = vadd.f32 %v2124_v35, %v2118_v14  ;;  %v5128_v25 = vadd.f32 %v2154_v26, %v2148_v7  ;;  %v1999_v18 = vmul.f32 %v1969_v36, %v4892_v44  ;;  %v5132_v21 = vmul.f32 %v1906_v62, %v4874_v32  ;;  %v2077_v62 = vld [vmem:[#allocation2 + $0x38] sm:$0xff] }
 0x42a   : > { %v5124_v45 = vmul.f32 %v5625_v24, %v1995_v2  ;;  %v2089_v13 = vmul.f32 %v2073_v22, %v1998_v60  ;;  %v2119_v58 = vmul.f32 %v2074_v38, %v1998_v60  ;;  %v2149_v47 = vmul.f32 %v2075_v6, %v1998_v60  ;;  %v2079_v22 = vld [vmem:[#allocation2 + $0x48] sm:$0xff]  ;;  %v2080_v38 = vld [vmem:[#allocation2 + $0x50] sm:$0xff] }
 0x42b   : > { %v2095_v8 = vmul.f32 %v1996_v10, %v4926_v48  ;;  %v5135_v19 = vadd.f32 %v2136_v12, %v2130_v20  ;;  %v2125_v46 = vmul.f32 %v1996_v10, %v4928_v50  ;;  %v2155_v41 = vmul.f32 %v1996_v10, %v4952_v15  ;;  %v1973_v7 = vpop.f32.mrb[52].mxu0  ;;  %v1910_v36 = vpop.f32.mrb[52].mxu1  ;;  %v2076_v15 = vld [vmem:[#allocation2 + $0x30] sm:$0xff] }
 0x42c   : > { %v5626_v30 = vsub.f32 %v4995_v4, %v4983_v16  ;;  %v5627_v32 = vsub.f32 %v4992_v5, %v4977_v59  ;;  %v5628_v48 = vsub.f32 %v4980_v61, %v4998_v49  ;;  %v2178_v50 = vpack.c.bf16 %v5132_v21, %v5106_v63  ;;  %v1975_v4 = vpop.f32.mrb[53].mxu0  ;;  %v1912_v16 = vpop.f32.mrb[53].mxu1  ;;  %v5658_v21 = vld [vmem:[#allocation57_spill] sm:$0xff] }
 0x42d   : > { %v2101_v44 = vadd.f32 %v2095_v8, %v2089_v13  ;;  %v2131_v35 = vadd.f32 %v2125_v46, %v2119_v58  ;;  %v5152_v26 = vadd.f32 %v2155_v41, %v2149_v47  ;;  %v2002_v23 = vmul.f32 %v1973_v7, %v4898_v51  ;;  %v1977_v59 = vpop.f32.mrb[54].mxu0  ;;  %v1914_v28 = vpop.f32.mrb[54].mxu1  ;;  %v5632_v46 = vld [vmem:[#allocation51_spill] sm:$0xff] }
 0x42e   : > { %v2107_v33 = vmul.f32 %v5626_v30, %v1999_v18  ;;  %v2137_v14 = vmul.f32 %v5627_v32, %v1999_v18  ;;  %v5148_v2 = vmul.f32 %v5628_v48, %v1999_v18  ;;  %v2000_v5 = vmul.f32 %v1910_v36, %v4864_v27  ;;  %v1979_v24 = vpop.f32.mrb[55].mxu0  ;;  %v1916_v60 = vpop.f32.mrb[55].mxu1  ;;  %v2081_v18 = vld [vmem:[#allocation2 + $0x58] sm:$0xff]  ;;  %v5635_v48 = vld [vmem:[#allocation41_spill] sm:$0xff] }
 0x42f   : > { %v2003_v61 = vmul.f32 %v1975_v4, %v4901_v54  ;;  %v5158_v49 = vmul.f32 %v1912_v16, %v4868_v29  ;;  %v2006_v12 = vmul.f32 %v1977_v59, %v4903_v56  ;;  %v2004_v6 = vmul.f32 %v1914_v28, %v4872_v31  ;;  %v5629_v29 = vld [vmem:[#allocation42_spill] sm:$0xff] }
 0x430   : > { %v5162_v10 = vadd.f32 %v2137_v14, %v2131_v35  ;;  %v2090_v51 = vmul.f32 %v2076_v15, %v2002_v23  ;;  %v2120_v20 = vmul.f32 %v2077_v62, %v2002_v23  ;;  %v2150_v27 = vmul.f32 %v2078_v37, %v2002_v23  ;;  %v5636_v62 = vld [vmem:[#allocation45_spill] sm:$0xff]  ;;  %v5638_v35 = vld [vmem:[#allocation30_spill] sm:$0xff] }
 0x431   : > { %v2096_v13 = vmul.f32 %v2000_v5, %v4930_v53  ;;  %v2126_v54 = vmul.f32 %v2000_v5, %v4932_v57  ;;  %v2156_v58 = vmul.f32 %v5629_v29, %v2000_v5  ;;  %v5630_v56 = vsub.f32 %v5019_v55, %v5025_v43  ;;  %v5634_v43 = vld [vmem:[#allocation40_spill] sm:$0xff]  ;;  %v2083_v29 = vld [vmem:[#allocation2 + $0x68] sm:$0xff] }
 0x432   : > { %v5631_v31 = vsub.f32 %v5028_v3, %v5007_v52  ;;  %v5633_v41 = vsub.f32 %v5010_v42, %v5632_v46  ;;  %v2091_v7 = vmul.f32 %v2079_v22, %v2006_v12  ;;  %v2121_v53 = vmul.f32 %v2080_v38, %v2006_v12  ;;  %v5637_v3 = vld [vmem:[#allocation35_spill] sm:$0xff] }
 0x433   : > { %v5170_v47 = vmul.f32 %v5630_v56, %v2003_v61  ;;  %v5180_v36 = vadd.f32 %v2096_v13, %v2090_v51  ;;  %v2132_v57 = vadd.f32 %v2126_v54, %v2120_v20  ;;  %v5182_v32 = vadd.f32 %v2156_v58, %v2150_v27  ;;  %v1983_v4 = vpop.f32.mrb[56].mxu0  ;;  %v1920_v42 = vpop.f32.mrb[56].mxu1  ;;  %v5642_v13 = vld [vmem:[#allocation55_spill] sm:$0xff]  ;;  %v2082_v54 = vld [vmem:[#allocation2 + $0x60] sm:$0xff]  ;;  %v2084_v58 = vld [vmem:[#allocation2 + $0x70] sm:$0xff] }
 0x434   : > { %v2138_v8 = vmul.f32 %v5631_v31, %v2003_v61  ;;  %v5178_v30 = vmul.f32 %v5633_v41, %v2003_v61  ;;  %v2151_v14 = vmul.f32 %v2081_v18, %v2006_v12  ;;  %v2097_v55 = vmul.f32 %v2004_v6, %v5634_v43  ;;  %v1985_v28 = vpop.f32.mrb[57].mxu0  ;;  %v1922_v61 = vpop.f32.mrb[57].mxu1  ;;  %v5641_v18 = vld [vmem:[#allocation52_spill] sm:$0xff]  ;;  %v5646_v41 = vld [vmem:[#allocation37_spill] sm:$0xff]  ;;  %v2085_v43 = vld [vmem:[#allocation2 + $0x78] sm:$0xff] }
 0x435   : > { %v2127_v15 = vmul.f32 %v2004_v6, %v5635_v48  ;;  %v2157_v52 = vmul.f32 %v5636_v62, %v2004_v6  ;;  %v2007_v37 = vmul.f32 %v1979_v24, %v5637_v3  ;;  %v5191_v23 = vmul.f32 %v1916_v60, %v5638_v35  ;;  %v1987_v51 = vpop.f32.mrb[58].mxu0  ;;  %v1924_v20 = vpop.f32.mrb[58].mxu1  ;;  %v5649_v48 = vld [vmem:[#allocation33_spill] sm:$0xff]  ;;  %v5650_v62 = vld [vmem:[#allocation39_spill] sm:$0xff] }
 0x436   : > { %v5188_v16 = vadd.f32 %v2138_v8, %v2132_v57  ;;  %v2112_v5 = vadd.f32 %v5114_v39, %v5119_v17  ;;  %v2113_v59 = vadd.f32 %v2107_v33, %v2101_v44  ;;  %v2103_v12 = vadd.f32 %v2097_v55, %v2091_v7  ;;  %v1989_v56 = vpop.f32.mrb[59].mxu0  ;;  %v5645_v8 = vld [vmem:[#allocation31_spill] sm:$0xff]  ;;  %v5648_v57 = vld [vmem:[#allocation38_spill] sm:$0xff]  ;;  %v2086_v55 = vld [vmem:[#allocation2 + $0x80] sm:$0xff] }
 0x437   : > { %v2133_v22 = vadd.f32 %v2127_v15, %v2121_v53  ;;  %v5195_v38 = vadd.f32 %v2157_v52, %v2151_v14  ;;  %v5639_v6 = vsub.f32 %v5049_v11, %v5055_v40  ;;  %v5640_v60 = vsub.f32 %v5058_v1, %v5031_v9  ;;  %v1926_v11 = vpop.f32.mrb[59].mxu1  ;;  %v5644_v40 = vld [vmem:[#allocation36_spill] sm:$0xff]  ;;  %v2087_v35 = vld [vmem:[#allocation2 + $0x88] sm:$0xff] }
 0x438   : > { %v5643_v39 = vsub.f32 %v5641_v18, %v5642_v13  ;;  %v2182_v33 = vpack.c.bf16 %v5191_v23, %v5158_v49  ;;  %v2179_v44 = vpack.c.bf16 %v2113_v59, %v2112_v5  ;;  %v2010_v31 = vmul.f32 %v1983_v4, %v5644_v40  ;;  %v5647_v1 = vld [vmem:[#allocation32_spill] sm:$0xff]  ;;  %v5651_v5 = vld [vmem:[#allocation43_spill] sm:$0xff] }
 0x439   : > { %v2109_v24 = vmul.f32 %v5639_v6, %v2007_v37  ;;  %v2139_v27 = vmul.f32 %v5640_v60, %v2007_v37  ;;  %v2008_v46 = vmul.f32 %v1920_v42, %v5645_v8  ;;  %v2011_v9 = vmul.f32 %v1985_v28, %v5646_v41  ;;  %v5652_v28 = vld [vmem:[#allocation47_spill] sm:$0xff]  ;;  %v5656_v60 = vld [vmem:[#allocation56_spill] sm:$0xff]  ;;  %v5664_v41 = vld [vmem:[#allocation61_spill] sm:$0xff] }
 0x43a   : > { %v2169_v17 = vmul.f32 %v5643_v39, %v2007_v37  ;;  %v2009_v7 = vmul.f32 %v1922_v61, %v5647_v1  ;;  %2201 = vmatprep.subr.bf16.mxu1 %v2179_v44  ;;  %v2014_v14 = vmul.f32 %v1987_v51, %v5648_v57  ;;  %v2012_v15 = vmul.f32 %v1924_v20, %v5649_v48  ;;  %v5655_v20 = vld [vmem:[#allocation50_spill] sm:$0xff]  ;;  %v5665_v1 = vld [vmem:[#allocation53_spill] sm:$0xff] }
 0x43b   : > { %v5212_v53 = vadd.f32 %v2139_v27, %v2133_v22  ;;  %v2015_v52 = vmul.f32 %v1989_v56, %v5650_v62  ;;  %2202 = vmatpush1.bf16.msra.mxu1 %v2178_v50  ;;  %v2092_v3 = vmul.f32 %v2082_v54, %v2010_v31  ;;  %v2122_v37 = vmul.f32 %v2083_v29, %v2010_v31  ;;  %v5653_v22 = vld [vmem:[#allocation49_spill] sm:$0xff]  ;;  %v5659_v50 = vld [vmem:[#allocation58_spill] sm:$0xff]  ;;  %v5661_v56 = vld [vmem:[#allocation44_spill] sm:$0xff] }
 0x43c   : > { %v2152_v4 = vmul.f32 %v2084_v58, %v2010_v31  ;;  %v2098_v42 = vmul.f32 %v2008_v46, %v4938_v0  ;;  %v2128_v59 = vmul.f32 %v2008_v46, %v5651_v5  ;;  %v2158_v61 = vmul.f32 %v2008_v46, %v5652_v28  ;;  %v5662_v31 = vld [vmem:[#allocation46_spill] sm:$0xff] }
 0x43d   : > { %v5654_v6 = vsub.f32 %v5073_v34, %v5653_v22  ;;  %v5657_v27 = vsub.f32 %v5655_v20, %v5656_v60  ;;  %v5660_v13 = vsub.f32 %v5658_v21, %v5659_v50  ;;  %v2093_v44 = vmul.f32 %v2085_v43, %v2014_v14  ;;  %v5663_v34 = vld [vmem:[#allocation48_spill] sm:$0xff]  ;;  %v5667_v62 = vld [vmem:[#allocation54_spill] sm:$0xff] }
 0x43e   : > { %v2104_v63 = vadd.f32 %v2098_v42, %v2092_v3  ;;  %v2123_v0 = vmul.f32 %v2086_v55, %v2014_v14  ;;  %v2134_v54 = vadd.f32 %v2128_v59, %v2122_v37  ;;  %v2164_v29 = vadd.f32 %v2158_v61, %v2152_v4  ;;  %v5668_v3 = vld [vmem:[#allocation59_spill] sm:$0xff]  ;;  %v5670_v55 = vld [vmem:[#allocation60_spill] sm:$0xff]  ;;  %v5671_v37 = vld [vmem:[#allocation62_spill] sm:$0xff] }
 0x43f   : > { %v2110_v51 = vmul.f32 %v5654_v6, %v2011_v9  ;;  %v2140_v18 = vmul.f32 %v5657_v27, %v2011_v9  ;;  %v2170_v39 = vmul.f32 %v5660_v13, %v2011_v9  ;;  %v2153_v58 = vmul.f32 %v2087_v35, %v2014_v14  ;;  %v5673_v35 = vld [vmem:[#allocation34_spill] sm:$0xff] }
 0x440   : > { %v2099_v40 = vmul.f32 %v2012_v15, %v5661_v56  ;;  %v2129_v8 = vmul.f32 %v2012_v15, %v5662_v31  ;;  %v2159_v46 = vmul.f32 %v2012_v15, %v5663_v34  ;;  %v5666_v57 = vsub.f32 %v5664_v41, %v5665_v1  ;;  %v3772_v49 = vld [vmem:[%s4614_s24 + $0x60] ss:$8 sps:$4 sm:$0xff]   ;;  %v3847_v56 = vld [vmem:[#allocation15 + $0x20] sm:$0xff]  ;;  %v5678_v34 = vld [vmem:[#allocation29_spill] sm:$0xff] }
 0x441   : > { %v5669_v42 = vsub.f32 %v5667_v62, %v5668_v3  ;;  %v2146_v9 = vadd.f32 %v2140_v18, %v2134_v54  ;;  %v5672_v4 = vsub.f32 %v5670_v55, %v5671_v37  ;;  %v2013_v59 = vmul.f32 %v1926_v11, %v5673_v35  ;;  %v3848_v41 = vld [vmem:[#allocation15 + $0x10] sm:$0xff]  ;;  %v3780_v3 = vld [vmem:[%s4616_s16 + $0x48] sm:$0xff]   ;;  %v3785_v55 = vld [vmem:[%s4616_s16 + $0x18] sm:$0xff]  }
 0x442   : > { %v2111_v48 = vmul.f32 %v5666_v57, %v2015_v52  ;;  %v2105_v43 = vadd.f32 %v2099_v40, %v2093_v44  ;;  %v2135_v28 = vadd.f32 %v2129_v8, %v2123_v0  ;;  %v2165_v61 = vadd.f32 %v2159_v46, %v2153_v58  ;;  %v3779_v62 = vld [vmem:[%s4616_s16] sm:$0xff]   ;;  %v3789_v35 = vld [vmem:[%s4616_s16 + $0x28] sm:$0xff]  }
 0x443   : > { %v2141_v5 = vmul.f32 %v5669_v42, %v2015_v52  ;;  %v2171_v14 = vmul.f32 %v5672_v4, %v2015_v52  ;;  %v2114_v15 = vadd.f32 %v5170_v47, %v5180_v36  ;;  %v2115_v22 = vadd.f32 %v2109_v24, %v2103_v12  ;;  %v3781_v42 = vld [vmem:[%s4616_s16 + $0x8] sm:$0xff]   ;;  %v3786_v37 = vld [vmem:[%s4616_s16 + $0x60] sm:$0xff]  }
 0x444   : > { %v2186_v6 = vpack.c.bf16 %v2013_v59, %v2009_v7  ;;  %v2116_v20 = vadd.f32 %v2110_v51, %v2104_v63  ;;  %v2117_v60 = vadd.f32 %v2111_v48, %v2105_v43  ;;  %v2172_v27 = vadd.f32 %v5124_v45, %v5128_v25  ;;  %v5676_v7 = vld [vmem:[#allocation27_spill] sm:$0xff]  ;;  %v5677_v51 = vld [vmem:[#allocation28_spill] sm:$0xff]  ;;  %v3778_v48 = vld [vmem:[%s4616_s16 + $0x40] sm:$0xff]  }
 0x445   : > { %v2147_v18 = vadd.f32 %v2141_v5, %v2135_v28  ;;  %v2183_v21 = vpack.c.bf16 %v2115_v22, %v2114_v15  ;;  %v2173_v50 = vadd.f32 %v5148_v2, %v5152_v26  ;;  %v2180_v11 = vpack.c.bf16 %v5162_v10, %v5135_v19  ;;  %v3753_v26 = vld [vmem:[%s5674_s26] sm:$0xff]   ;;  %v3784_v43 = vld [vmem:[%s4616_s16 + $0x58] sm:$0xff]   ;;  %v3787_v4 = vld [vmem:[%s4616_s16 + $0x20] sm:$0xff]  }
 0x446   : > { %v2187_v52 = vpack.c.bf16 %v2117_v60, %v2116_v20  ;;  %v2174_v13 = vadd.f32 %v5178_v30, %v5182_v32  ;;  %v2175_v47 = vadd.f32 %v2169_v17, %v5195_v38  ;;  %v2184_v36 = vpack.c.bf16 %v5212_v53, %v5188_v16  ;;  %v3774_v30 = vld [vmem:[%s4614_s24 + $0x64] ss:$8 sps:$4 sm:$0xff]   ;;  %v3775_v32 = vld [vmem:[%s4614_s24 + $0x70] ss:$8 sps:$4 sm:$0xff]   ;;  %v3777_v16 = vld [vmem:[%s4614_s24 + $0x74] ss:$8 sps:$4 sm:$0xff]  }
 0x447   : > { %2203 = vmatprep.subr.bf16.mxu1 %v2183_v21  ;;  %v2181_v12 = vpack.c.bf16 %v2173_v50, %v2172_v27  ;;  %v2176_v45 = vadd.f32 %v2170_v39, %v2164_v29  ;;  %v2177_v25 = vadd.f32 %v2171_v14, %v2165_v61  ;;  %v2188_v24 = vpack.c.bf16 %v2147_v18, %v2146_v9  ;;  %v3846_v29 = vld [vmem:[#allocation15 + $0x8] sm:$0xff]  ;;  %v3782_v5 = vld [vmem:[%s4616_s16 + $0x50] sm:$0xff]   ;;  %v3788_v14 = vld [vmem:[%s4616_s16 + $0x68] sm:$0xff]  }
 0x448   : > { %2204 = vmatpush1.bf16.msra.mxu1 %v2182_v33  ;;  %v2185_v19 = vpack.c.bf16 %v2175_v47, %v2174_v13  ;;  %v5675_v10 = vmov 0   ;;  %2406 = vmatprep.subr.bf16.mxu0 %v3774_v30  ;;  %v3783_v9 = vld [vmem:[%s4616_s16 + $0x10] sm:$0xff]   ;;  %v3792_v61 = vld [vmem:[%s4616_s16 + $0x78] sm:$0xff]   ;;  %v5679_v22 = vmov 0.0  }
 0x449   : > { %2205 = vmatprep.subr.bf16.mxu1 %v2187_v52  ;;  %v2189_v2 = vpack.c.bf16 %v2177_v25, %v2176_v45  ;;  %2407 = vmatpush1.bf16.msra.mxu0 %v3772_v49  ;;  %v3790_v59 = vld [vmem:[%s4616_s16 + $0x70] sm:$0xff]   ;;  %v3793_v15 = vld [vmem:[%s4616_s16 + $0x38] sm:$0xff]  }
 0x44a   : > { %2408 = vmatprep.subr.bf16.mxu0 %v3777_v16  ;;  %v3791_v28 = vld [vmem:[%s4616_s16 + $0x30] sm:$0xff]  }
 0x44c   : > { %2206 = vmatpush1.bf16.msra.mxu1 %v2186_v6 }
 0x44d   : > { %2244 = vmatprep.subr.bf16.mxu1 %v2181_v12  ;;  %2409 = vmatpush1.bf16.msra.mxu0 %v3775_v32 }
 0x44f   : > { %3354 = vmatmul.mubr.msk.bf16.vlgmr.msra.gmra.mrb[60].mxu1 %vm2197_vm2, %v3753_v26 }
 0x450   : > { %2245 = vmatpush1.bf16.msra.mxu1 %v2180_v11  ;;  %2276 = vmatprep.mubr.bf16.mxu1 %v5675_v10 }
 0x451   : > { %2246 = vmatprep.subr.bf16.mxu1 %v2185_v19 }
 0x454   : > { %2247 = vmatpush1.bf16.msra.mxu1 %v2184_v36 }
 0x455   : > { %2248 = vmatprep.subr.bf16.mxu1 %v2189_v2 }
 0x458   : > { %2249 = vmatpush1.bf16.msra.mxu1 %v2188_v24 }
 0x459   : > { %3442 = vmatprep.subr.bf16.mxu1 %v3778_v48 }
 0x45b   : > { %3355 = vmatmul.mubr.msk.bf16.vlgmr.msra.gmra.mrb[64].mxu1 %vm2197_vm2, %v3753_v26 }
 0x45c   : > { %3443 = vmatpush3.bf16.msra.mxu1 %v3779_v62 }
 0x45d   : > { %3444 = vmatprep.subr.bf16.mxu1 %v3780_v3  ;;  %v3850_v3 = vld [vmem:[#allocation14 + $0x8] sm:$0xff] }
 0x460   : > { %3445 = vmatpush3.bf16.msra.mxu1 %v3781_v42 }
 0x461   : > { %3446 = vmatprep.subr.bf16.mxu1 %v3782_v5 }
 0x464   : > { %3447 = vmatpush3.bf16.msra.mxu1 %v3783_v9 }
 0x465   : > { %3448 = vmatprep.subr.bf16.mxu1 %v3784_v43 }
 0x468   : > { %3449 = vmatpush3.bf16.msra.mxu1 %v3785_v55 }
 0x469   : > { %3450 = vmatprep.subr.bf16.mxu1 %v3786_v37 }
 0x46c   : > { %3451 = vmatpush3.bf16.msra.mxu1 %v3787_v4 }
 0x46d   : > { %3452 = vmatprep.subr.bf16.mxu1 %v3788_v14  ;;  %v3794_v14 = vld [vmem:[%s4646_s30] ss:$12 sps:$4 sm:$0xff]  }
 0x470   : > { %3453 = vmatpush3.bf16.msra.mxu1 %v3789_v35  ;;  %v3797_v35 = vld [vmem:[%s4646_s30 + $0x8] ss:$12 sps:$4 sm:$0xff]  }
 0x471   : > { %3454 = vmatprep.subr.bf16.mxu1 %v3790_v59  ;;  %v3800_v59 = vld [vmem:[%s4646_s30 + $0x1c] ss:$12 sps:$4 sm:$0xff]  }
 0x474   : > { %3455 = vmatpush3.bf16.msra.mxu1 %v3791_v28  ;;  %v3798_v28 = vld [vmem:[%s4646_s30 + $0x18] ss:$12 sps:$4 sm:$0xff]  }
 0x475   : > { %3456 = vmatprep.subr.bf16.mxu1 %v3792_v61  ;;  %v3801_v61 = vld [vmem:[%s4646_s30 + $0x20] ss:$12 sps:$4 sm:$0xff]  }
 0x478   : > { %3457 = vmatpush3.bf16.msra.mxu1 %v3793_v15  ;;  %v3804_v15 = vld [vmem:[%s4646_s30 + $0x34] ss:$12 sps:$4 sm:$0xff]  }
 0x479   : > { %3507 = vmatprep.subr.bf16.mxu1 %v5679_v22 }
 0x522   : > { %v5269_v23 = vpop.f32.mrb[60].mxu1 }
 0x523   : > { %v2237_v38 = vpop.f32.mrb[61].mxu1 }
 0x524   : > { %v5271_v17 = vpop.f32.mrb[62].mxu1  ;;  %v5274_v53 = vadd.f32 %v2237_v38, %v5676_v7 }
 0x525   : > { %v2241_v33 = vpop.f32.mrb[63].mxu1  ;;  %v5340_v42 = vadd.f32 %v3850_v3, %v5271_v17  ;;  %v3796_v17 = vld [vmem:[%s4646_s30 + $0x4] ss:$12 sps:$4 sm:$0xff]  }
 0x526   : > { %v5277_v63 = vadd.f32 %v2241_v33, %v5677_v51  ;;  %2853 = vmatprep.subr.bf16.mxu0 %v3796_v17 }
 0x528   : > { %v2295_v39 = vpack.c.bf16 %v5277_v63, %v5274_v53 }
 0x52a   : > { %2427 = vmatmul.mubr.bf16.vlgmr.msra.gmra.mrb[60].mxu0 %v2295_v39 }
 0x52b   : > { %2436 = vmatprep.mubr.bf16.mxu0 %v5675_v10  ;;  %2854 = vmatpush1.bf16.msra.mxu0 %v3794_v14 }
 0x52c   : > { %2855 = vmatprep.subr.bf16.mxu0 %v3800_v59 }
 0x52e   : > { %v2278_v44 = vpop.f32.mrb[64].mxu1 }
 0x52f   : > { %v2280_v0 = vpop.f32.mrb[65].mxu1  ;;  %v5282_v58 = vadd.f32 %v3846_v29, %v2278_v44  ;;  %2856 = vmatpush1.bf16.msra.mxu0 %v3798_v28 }
 0x530   : > { %v2282_v54 = vpop.f32.mrb[66].mxu1  ;;  %v5292_v1 = vadd.f32 %v3848_v41, %v2280_v0  ;;  %v3849_v41 = vld [vmem:[#allocation14] sm:$0xff]  ;;  %2857 = vmatprep.subr.bf16.mxu0 %v3804_v15 }
 0x531   : > { %v5284_v40 = vadd.f32 %v3847_v56, %v2282_v54  ;;  %v2284_v31 = vpop.f32.mrb[67].mxu1 }
 0x532   : > { %v5290_v46 = vadd.f32 %v2284_v31, %v5678_v34 }
 0x533   : > { %v2296_v8 = vpack.c.bf16 %v5284_v40, %v5282_v58 }
 0x534   : > { %v2297_v57 = vpack.c.bf16 %v5290_v46, %v5292_v1 }
 0x535   : > { %2437 = vmatmul.mubr.bf16.gmra.mrb[64].mxu0 %v2296_v8 }
 0x536   : > { %2446 = vmatprep.mubr.bf16.mxu0 %v5675_v10 }
 0x53d   : > { %2447 = vmatmul.mubr.bf16.gmra.mrb[68].mxu0 %v2297_v57  ;;  %v5337_v57 = vadd.f32 %v3849_v41, %v5269_v23 }
 0x53e   : > { %2885 = vmatprep.mubr.bf16.mxu0 %v5675_v10 }
 0x53f   : > { %v2483_v4 = vpack.c.bf16 %v5340_v42, %v5337_v57 }
 0x5fd   : > { %v5314_v6 = vpop.f32.mrb[60].mxu0 }
 0x5fe   : > { %v2430_v20 = vpop.f32.mrb[61].mxu0 }
 0x5ff   : > { %v2949_v60 = vmul.f32 %v2430_v20, %v5314_v6  ;;  %v5317_v27 = vpop.f32.mrb[62].mxu0  ;;  %v2457_v52 = vmul.f32 %v2430_v20, %v2430_v20  ;;  %v3802_v20 = vld [vmem:[%s4646_s30 + $0x30] ss:$12 sps:$4 sm:$0xff]  }
 0x600   : > { %v2434_v18 = vpop.f32.mrb[63].mxu0  ;;  %2858 = vmatpush1.bf16.msra.mxu0 %v3802_v20 }
 0x601   : > { %v2950_v21 = vmul.f32 %v2434_v18, %v5317_v27  ;;  %v2458_v12 = vmul.f32 %v2434_v18, %v2434_v18  ;;  %v3808_v18 = vld [vmem:[%s4646_s30 + $0x4c] ss:$12 sps:$4 sm:$0xff]  }
 0x602   : > { %2859 = vmatprep.subr.bf16.mxu0 %v3808_v18 }
 0x608   : > { %v5320_v50 = vpop.f32.mrb[64].mxu0 }
 0x609   : > { %v2440_v11 = vpop.f32.mrb[65].mxu0 }
 0x60a   : > { %v2459_v13 = vmul.f32 %v2440_v11, %v2440_v11  ;;  %v2951_v47 = vmul.f32 %v2440_v11, %v5320_v50  ;;  %v5323_v36 = vpop.f32.mrb[66].mxu0  ;;  %v3809_v11 = vld [vmem:[%s4646_s30 + $0x50] ss:$12 sps:$4 sm:$0xff]  }
 0x60b   : > { %v2444_v45 = vpop.f32.mrb[67].mxu0 }
 0x60c   : > { %v2461_v25 = vadd.f32 %v2459_v13, %v2457_v52  ;;  %v2953_v24 = vadd.f32 %v2951_v47, %v2949_v60  ;;  %v2460_v19 = vmul.f32 %v2444_v45, %v2444_v45  ;;  %v2952_v2 = vmul.f32 %v2444_v45, %v5323_v36  ;;  %v3805_v60 = vld [vmem:[%s4646_s30 + $0x38] ss:$12 sps:$4 sm:$0xff]   ;;  %v3810_v13 = vld [vmem:[%s4646_s30 + $0x60] ss:$12 sps:$4 sm:$0xff]   ;;  %v3813_v47 = vld [vmem:[%s4646_s30 + $0x68] ss:$12 sps:$4 sm:$0xff]  }
 0x60d   : > { %v3812_v52 = vld [vmem:[%s4646_s30 + $0x64] ss:$12 sps:$4 sm:$0xff]  }
 0x60e   : > { %v2462_v26 = vadd.f32 %v2460_v19, %v2458_v12  ;;  %v2954_v10 = vadd.f32 %v2952_v2, %v2950_v21  ;;  %v3806_v21 = vld [vmem:[%s4646_s30 + $0x48] ss:$12 sps:$4 sm:$0xff]   ;;  %v3814_v45 = vld [vmem:[%s4646_s30 + $0x78] ss:$12 sps:$4 sm:$0xff]   ;;  %v3818_v19 = vld [vmem:[%s4646_s30 + $0x90] ss:$12 sps:$4 sm:$0xff]  }
 0x60f   : > { %2860 = vmatpush1.bf16.msra.mxu0 %v3806_v21  ;;  %v3816_v12 = vld [vmem:[%s4646_s30 + $0x7c] ss:$12 sps:$4 sm:$0xff]   ;;  %v3821_v2 = vld [vmem:[%s4646_s30 + $0x98] ss:$12 sps:$4 sm:$0xff]  }
 0x610   : > { %v5326_v49 = vpop.f32.mrb[68].mxu0  ;;  %2861 = vmatprep.subr.bf16.mxu0 %v3812_v52 }
 0x611   : > { %v2450_v30 = vpop.f32.mrb[69].mxu0 }
 0x612   : > { %v2463_v32 = vmul.f32 %v2450_v30, %v2450_v30  ;;  %v2955_v16 = vmul.f32 %v2450_v30, %v5326_v49  ;;  %v5329_v38 = vpop.f32.mrb[70].mxu0  ;;  %v3825_v30 = vld [vmem:[%s4646_s30 + $0xb0] ss:$12 sps:$4 sm:$0xff]  }
 0x613   : > { %v2454_v33 = vpop.f32.mrb[71].mxu0  ;;  %2862 = vmatpush1.bf16.msra.mxu0 %v3810_v13 }
 0x614   : > { %v2465_v7 = vadd.f32 %v2463_v32, %v2461_v25  ;;  %v5331_v51 = vadd.f32 %v2955_v16, %v2953_v24  ;;  %v2464_v39 = vmul.f32 %v2454_v33, %v2454_v33  ;;  %v2956_v44 = vmul.f32 %v2454_v33, %v5329_v38  ;;  %v3817_v25 = vld [vmem:[%s4646_s30 + $0x80] ss:$12 sps:$4 sm:$0xff]   ;;  %2863 = vmatprep.subr.bf16.mxu0 %v3816_v12  ;;  %v3372_v16 = vld [vmem:[%s790_s23] ss:$0 sm:$0xff]  ;;  %s2992_s23 = sshll.u32 %s4188_s20, 4  ;;  %s2993_s23 = int_to_ptr.vmem [resolvable:$true] %s2992_s23 }
 0x615   : > { %v3820_v24 = vld [vmem:[%s4646_s30 + $0x94] ss:$12 sps:$4 sm:$0xff]   ;;  %s4059_s9 = scalar_lea.vmem %s2993_s23, 768  ;;  %p4066_p10 = scmp.lt.s32.totalorder %s2993_s23, %s2993_s23 }
 0x616   : > { %v2467_v0 = vadd.f32 1e-15, %v2465_v7  ;;  %v2466_v54 = vadd.f32 %v2464_v39, %v2462_v26  ;;  %v5334_v29 = vadd.f32 %v2956_v44, %v2954_v10  ;;  %v3824_v26 = vld [vmem:[%s4646_s30 + $0xac] ss:$12 sps:$4 sm:$0xff]   ;;  %v3822_v10 = vld [vmem:[%s4646_s30 + $0xa8] ss:$12 sps:$4 sm:$0xff]   ;;  %p4060_p0 = scmp.ne.s32.totalorder %s2993_s23, %s4059_s9  ;;  %p4067_p11 = scmp.lt.s32.totalorder %s4059_s9, %s4059_s9 }
 0x617   : > { %2864 = vmatpush1.bf16.msra.mxu0 %v3814_v45 }
 0x618   : > { %3834 = vrsqrt.f32 %v2467_v0  ;;  %v2468_v56 = vadd.f32 1e-15, %v2466_v54  ;;  %vm2471_vm3 = vcmp.eq.f32.partialorder %v2467_v0, inf  ;;  %v2474_v5 = vand.u32 2147483648, %v2467_v0  ;;  %2865 = vmatprep.subr.bf16.mxu0 %v3820_v24  ;;  %p4061_p9 = pnand %p4060_p0, %p3583_p4  ;;  %p4068_p2 = por %p4067_p11, %p4066_p10 }
 0x619   : > { %vm2473_vm5 = vcmp.eq.f32.partialorder %v2467_v0, 0.0 }
 0x61a   : > { %3836 = vrsqrt.f32 %v2468_v56  ;;  %vm2478_vm4 = vcmp.eq.f32.partialorder %v2468_v56, inf  ;;  %v2481_v9 = vand.u32 2147483648, %v2468_v56  ;;  %vm2480_vm6 = vcmp.eq.f32.partialorder %v2468_v56, 0.0  ;;  %p4062_p7 = pneg %p4061_p9 }
 0x61b   : > { %2866 = vmatpush1.bf16.msra.mxu0 %v3818_v19 }
 0x61c   : > { %2867 = vmatprep.subr.bf16.mxu0 %v3824_v26  ;;  %p4069_p6 = pnand %p4068_p2, %p4062_p7 }
 0x61f   : > { %2868 = vmatpush1.bf16.msra.mxu0 %v3822_v10 }
 0x622   : > { %v3835_v31 = vpop.eup %3834 }
 0x623   : > { %v2470_v8 = vmul.f32 %v3835_v31, %v2467_v0 }
 0x624   : > { %v3837_v34 = vpop.eup %3836 }
 0x625   : > { %v2472_v48 = vsel %vm2471_vm3, %v2467_v0, %v2470_v8  ;;  %v2477_v62 = vmul.f32 %v3837_v34, %v2468_v56 }
 0x626   : > { %v2475_v55 = vsel %vm2473_vm5, %v2474_v5, %v2472_v48 }
 0x627   : > { %v2479_v43 = vsel %vm2478_vm4, %v2468_v56, %v2477_v62 }
 0x628   : > { %v2482_v23 = vsel %vm2480_vm6, %v2481_v9, %v2479_v43 }
 0x629   : > { %v2484_v37 = vpack.c.bf16 %v2482_v23, %v2475_v55  ;;  %v2708_v55 = vld [vmem:[%s4644_s25] sm:$0x7]  ;;  %v5681_v23 = vld [vmem:[#allocation26_spill] sm:$0xff]  ;;  %s4189_s25 = smov [#allocation14]  }
 0x62a   : > { %v5683_v17 = vsub.s32 1, %v5681_v23  ;;  %v5684_v59 = vsub.s32 2, %v5681_v23  ;;  %s2979_s30 = sshll.u32 %s4189_s25, 4  ;;  %s5406_s30 = int_to_ptr.vmem [resolvable:$true] %s2979_s30 }
 0x62b   : > { %2652 = vmatprep.mubr.bf16.mxu1 %v2484_v37  ;;  %v5682_v37 = vsub.s32 0, %v5681_v23 }
 0x62c   : > { %2653 = vmatmul.mubr.bf16.vlgmr.msra.gmra.mrb[68].mxu1 %v2483_v4  ;;  %v2717_v14 = vrot.slane %v2708_v55, %v5683_v17  ;;  %v2721_v28 = vrot.slane %v2708_v55, %v5684_v59 }
 0x62d   : > { %3523 = vmatprep.mubr.msk.bf16.mxu1 %vm4186_vm0, %v5679_v22  ;;  %3508 = vmatpush3.bf16.msra.mxu1 %v3797_v35  ;;  %v2713_v4 = vrot.slane %v2708_v55, %v5682_v37 }
 0x62e   : > { %3509 = vmatprep.subr.bf16.mxu1 %v5679_v22 }
 0x631   : > { %3510 = vmatpush3.bf16.msra.mxu1 %v3801_v61 }
 0x632   : > { %3511 = vmatprep.subr.bf16.mxu1 %v5679_v22 }
 0x635   : > { %3512 = vmatpush3.bf16.msra.mxu1 %v3805_v60 }
 0x636   : > { %3513 = vmatprep.subr.bf16.mxu1 %v5679_v22 }
 0x639   : > { %3514 = vmatpush3.bf16.msra.mxu1 %v3809_v11 }
 0x63a   : > { %3515 = vmatprep.subr.bf16.mxu1 %v5679_v22 }
 0x63d   : > { %3516 = vmatpush3.bf16.msra.mxu1 %v3813_v47 }
 0x63e   : > { %3517 = vmatprep.subr.bf16.mxu1 %v5679_v22 }
 0x641   : > { %3518 = vmatpush3.bf16.msra.mxu1 %v3817_v25 }
 0x642   : > { %3519 = vmatprep.subr.bf16.mxu1 %v5679_v22 }
 0x645   : > { %3520 = vmatpush3.bf16.msra.mxu1 %v3821_v2 }
 0x646   : > { %3521 = vmatprep.subr.bf16.mxu1 %v5679_v22 }
 0x649   : > { %3522 = vmatpush3.bf16.msra.mxu1 %v3825_v30 }
 0x6ff   : > { %v3458_v32 = vpop.f32.mrb[68].mxu1 }
 0x700   : > { %v3459_v33 = vpop.f32.mrb[69].mxu1 }
 0x701   : > { %v3460_v7 = vadd.f32 %v3459_v33, %v3458_v32  ;;  %v3461_v39 = vpop.f32.mrb[70].mxu1 }
 0x702   : > { %v3462_v44 = vpop.f32.mrb[71].mxu1 }
 0x703   : > { %v2655_v0 = vadd.f32 %v3460_v7, %v3372_v16  ;;  %v3463_v54 = vadd.f32 %v3462_v44, %v3461_v39 }
 0x705   : > { %v3389_v56 = vmul.f32 -1.442695, %v2655_v0  ;;  %v2658_v31 = vadd.f32 %v3463_v54, %v3372_v16 }
 0x707   : > { %3838 = vpow2.f32 %v3389_v56  ;;  %v3390_v8 = vmul.f32 -1.442695, %v2658_v31 }
 0x709   : > { %3840 = vpow2.f32 %v3390_v8 }
 0x711   : > { %v3839_v22 = vpop.eup %3838 }
 0x712   : > { %v2667_v34 = vadd.f32 1.0, %v3839_v22 }
 0x713   : > { %v3841_v41 = vpop.eup %3840 }
 0x714   : > { %3842 = vrcp.f32 %v2667_v34  ;;  %v2668_v48 = vadd.f32 1.0, %v3841_v41 }
 0x716   : > { %3844 = vrcp.f32 %v2668_v48 }
 0x71e   : > { %v3843_v62 = vpop.eup %3842 }
 0x71f   : > { %v2673_v5 = vmul.f32 %v3843_v62, %v2655_v0 }
 0x720   : > { %v3845_v3 = vpop.eup %3844 }
 0x721   : > { %v2674_v9 = vmul.f32 %v3845_v3, %v2658_v31 }
 0x723   : > { %v2675_v43 = vpack.c.bf16 %v2674_v9, %v2673_v5 }
 0x725   : > { %2886 = vmatmul.mubr.bf16.vlgmr.msra.gmra.mrb[72].mxu0 %v2675_v43  ;;  %3524 = vmatmul.mubr.bf16.vlgmr.msra.gmra.mrb[72].mxu1 %v2675_v43 }
 0x7f8   : > { %v2887_v35 = vpop.f32.mrb[72].mxu0  ;;  %v2930_v61 = vpop.f32.mrb[72].mxu1 }
 0x7f9   : > { %v2888_v15 = vadd.f32 %v2887_v35, %v2713_v4  ;;  %v2889_v20 = vpop.f32.mrb[73].mxu0  ;;  %v3525_v60 = vpop.f32.mrb[73].mxu1  ;;  %v2931_v24 = vadd.f32 %v2930_v61, %v2721_v28 }
 0x7fa   : > { %v2890_v18 = vadd.f32 %v2889_v20, %v2717_v14  ;;  %v2891_v21 = vpop.f32.mrb[74].mxu0  ;;  %v2933_v11 = vpop.f32.mrb[74].mxu1 }
 0x7fb   : > { %v2937_v52 = vmul.f32 %v2888_v15, %v5314_v6  ;;  %v2941_v13 = vmul.f32 %v2888_v15, %v5320_v50  ;;  %v2945_v47 = vmul.f32 %v2888_v15, %v5326_v49  ;;  %v2892_v12 = vadd.f32 %v2891_v21, %v2713_v4  ;;  %v2893_v45 = vpop.f32.mrb[75].mxu0  ;;  %v3526_v25 = vpop.f32.mrb[75].mxu1 }
 0x7fc   : > { %v2959_v19 = vmul.f32 %v5331_v51, %v2890_v18  ;;  %v2894_v2 = vadd.f32 %v2893_v45, %v2717_v14 }
 0x7fd   : > { %v2939_v26 = vadd.f32 %v2937_v52, %v5274_v53  ;;  %v2943_v10 = vadd.f32 %v2941_v13, %v5282_v58  ;;  %v2947_v30 = vadd.f32 %v2945_v47, %v5292_v1  ;;  %v2938_v6 = vmul.f32 %v2892_v12, %v5317_v27 }
 0x7fe   : > { %v2961_v50 = vadd.f32 %v2959_v19, %v5337_v57  ;;  %v2942_v49 = vmul.f32 %v2892_v12, %v5323_v36  ;;  %v2946_v32 = vmul.f32 %v2892_v12, %v5329_v38  ;;  %v2960_v16 = vmul.f32 %v5334_v29, %v2894_v2 }
 0x7ff   : > { %2967 = vst [vmem:[#allocation15] sm:$0xff] %v2939_v26  ;;  %2968 = vst [vmem:[#allocation15 + $0x8] sm:$0xff] %v2943_v10  ;;  %v2940_v53 = vadd.f32 %v2938_v6, %v5277_v63  ;;  %v2934_v58 = vadd.f32 %v2933_v11, %v2721_v28 }
 0x800   : > { %2969 = vst [vmem:[#allocation15 + $0x10] sm:$0xff] %v2947_v30  ;;  %v2963_v1 = vadd.f32 %v2961_v50, %v2931_v24  ;;  %v2944_v27 = vadd.f32 %v2942_v49, %v5284_v40  ;;  %v2948_v51 = vadd.f32 %v2946_v32, %v5290_v46  ;;  %v2962_v36 = vadd.f32 %v2960_v16, %v5340_v42 }
 0x801   : > { %2970 = vst [vmem:[#allocation15 + $0x18] sm:$0xff] %v2940_v53 }
 0x802   : > { %2965 = vst [vmem:[#allocation14] sm:$0xff] %v2963_v1  ;;  %2971 = vst [vmem:[#allocation15 + $0x20] sm:$0xff] %v2944_v27  ;;  %v2964_v38 = vadd.f32 %v2962_v36, %v2934_v58 }
 0x803   : > { %2972 = vst [vmem:[#allocation15 + $0x28] sm:$0xff] %v2948_v51 }
 0x804   : > { %4072 = shalt.err (!%p4069_p6)
}
 0x805   : > { %s5685_s27 = sld [smem:[#allocation73_spill]] }
 0x80b   : > { %s4073_s12 = scalar_lea.hbm %s5685_s27, 768 }
 0x80c   : > { %p4074_p1 = scmp.ne.s32.totalorder %s5685_s27, %s4073_s12  ;;  %p4079_p3 = scmp.lt.u32.totalorder %s4073_s12, %s5685_s27 }
 0x80e   : > { %p4075_p13 = pnand %p4074_p1, %p3583_p4 }
 0x810   : > { %p4076_p12 = pneg %p4075_p13 }
 0x812   : > { %p4081_p5 = pnand %p4079_p3, %p4076_p12 }
 0x814   : > { %4084 = shalt.err (!%p4081_p5)
}
 0x815   : > { %s4190_s14 = smov 384   ;;  %s4191_s5 = smov 24   ;;  %2966 = vst [vmem:[#allocation14 + $0x8] sm:$0xff] %v2964_v38 }
 0x816   : > { %3552 = dma.vmem_to_hbm [thread:$0]  (%p3583_p4), %s2993_s23, 768, %s5685_s27, [#allocation16], %s4190_s14, %s4190_s14, %s4191_s5  }
 0x817   : > { %s4085_s24 = scalar_lea.vmem %s5406_s30, 256  ;;  %p4092_p7 = scmp.lt.s32.totalorder %s5406_s30, %s5406_s30 }
 0x818   : > { %p4086_p8 = scmp.ne.s32.totalorder %s5406_s30, %s4085_s24  ;;  %p4093_p10 = scmp.lt.s32.totalorder %s4085_s24, %s4085_s24 }
 0x81a   : > { %p4087_p0 = pnand %p4086_p8, %p3583_p4  ;;  %p4094_p11 = por %p4093_p10, %p4092_p7 }
 0x81c   : > { %p4088_p9 = pneg %p4087_p0 }
 0x81e   : > { %p4095_p2 = pnand %p4094_p11, %p4088_p9 }
 0x820   : > { %4098 = shalt.err (!%p4095_p2)
}
 0x821   : > { %s5686_s20 = sld [smem:[#allocation72_spill]] }
 0x827   : > { %s4099_s25 = scalar_lea.hbm %s5686_s20, 256 }
 0x828   : > { %p4100_p6 = scmp.ne.s32.totalorder %s5686_s20, %s4099_s25  ;;  %p4105_p12 = scmp.lt.u32.totalorder %s4099_s25, %s5686_s20 }
 0x82a   : > { %p4101_p1 = pnand %p4100_p6, %p3583_p4 }
 0x82c   : > { %p4102_p13 = pneg %p4101_p1 }
 0x82e   : > { %p4107_p3 = pnand %p4105_p12, %p4102_p13 }
 0x830   : > { %4110 = shalt.err (!%p4107_p3)
}
 0x831   : > { %s4192_s12 = smov 128   ;;  %s4193_s7 = smov 8  }
 0x832   : > { %3550 = dma.vmem_to_hbm [thread:$0]  (%p3583_p4), %s5406_s30, 256, %s5686_s20, [#allocation4], %s4192_s12, %s4192_s12, %s4193_s7  }
 0x833   : > { %4144 = dma.done.wait (%p3583_p4), [#allocation4], 256  }
 0x834   : > { %4146 = vsyncadd (%p3583_p4), [#allocation4], 4294967040 }
 0x835   : > { %4148 = dma.done.wait (%p3583_p4), [#allocation16], 768  }
 0x836   : > { %4150 = vsyncadd (%p3583_p4), [#allocation16], 4294966528 }
 0x837 PF: > { %s5687_s24 = sld [smem:[#allocation24_spill]]  ;;  %s5688_s1 = sld [smem:[#allocation23_spill]] }
 0x838   : > { %s5689_s23 = sld [smem:[#allocation25_spill]]  ;;  %s5690_s21 = smov %s4157_s22 }
 0x83d   : > { %p36_p5 = scmp.ge.s32.totalorder %s5687_s24, 4   ;;  %s5691_s22 = smov %s5688_s1 }
 0x83f   :  { %38 = sbr.rel (!%p36_p5) target bundleno = 22 (0x16), region = 205 }
 0x846   :  { %3012 = vsyncpa [#allocation3], 1 }
 0x847   :  { %3014 = vsyncpa [#allocation3 + $0x1], 1 }
 0x848   :  { %3015 = vsyncpa [#allocation6], 1 }
 0x849   :  { %3017 = vsyncpa [#allocation6 + $0x1], 1 }
 0x84a   :  { %3018 = vsyncpa [#allocation9], 1 }
 0x84b   :  { %3020 = vsyncpa [#allocation9 + $0x1], 1 }
 0x84c   :  { %3021 = vsyncpa [#allocation12], 1 }
 0x84d   :  { %3023 = vsyncpa [#allocation12 + $0x1], 1 }
 0x84e   :  { %3024 = vsyncpa [#allocation4], 1 }
 0x84f   :  { %3026 = vsyncpa [#allocation4 + $0x1], 1 }
 0x850   :  { %3027 = vsyncpa [#allocation16], 1 }

</bundles_post_ra>
